<compile_context>
chip_gen: v5e
topology: v5e:2x2
jax: 0.10.0
libtpu: 0.0.40
codegen_flags: <defaults>
</compile_context>

<pallas_src>
import jax
import jax.numpy as jnp
from jax.experimental import pallas as pl
from jax.experimental.pallas import tpu as pltpu  # noqa: F401  (TPU backend; no TPU-specific knobs needed here)

LAYER_THICK = 16


# ---------------------------------------------------------------------------
# Fused FPN top-down kernel (single grid-less step, everything VMEM resident).
#
# Layout: channels (16) on sublanes, flattened (N, H, W) spatial on lanes.
# "Wide" tensors carry a halo of (W + 1) don't-care lanes on each side so that
# every 3x3 tap is an in-range static lane slice; taps that would cross a
# row / image boundary are zeroed by precomputed (9, M) masks.
# ---------------------------------------------------------------------------
def _build_kernel(n_img, hw2, hw3, hw4):
    C = LAYER_THICK
    (H2, W2), (H3, W3), (H4, W4) = hw2, hw3, hw4

    def mm(a, b):
        return jnp.dot(a, b, preferred_element_type=jnp.float32)

    def kernel(c5_ref, c4_ref, c3_ref, c2_ref,      # activations (Cin, M [+ 2*halo])
               w5_ref, w4_ref, w3_ref, w2_ref,      # 1x1 lateral weights (16, Cin)
               k4_ref, k3_ref, k2_ref,              # 3x3 weights (9*16, 16), tap-major rows
               u4_ref, u3_ref, u2_ref,              # upsample ops (M_in, M_out + 2*halo)
               m4_ref, m3_ref, m2_ref,              # tap validity masks (9, M)
               p2_ref, p3_ref, p4_ref, p5_ref):     # outputs (16, M)

        def smooth3x3(pre_wide, kcat_ref, mask_ref, H, W):
            """'same' 3x3 conv of a halo-padded flat map (16, M+2*halo) -> (16, M)."""
            M = n_img * H * W
            halo = W + 1
            # Centre tap (kh = kw = 1): always valid, no shift / mask needed.
            out = mm(kcat_ref[4 * C:5 * C, :], pre_wide[:, halo:halo + M])
            for kh in range(3):
                for kw in range(3):
                    if kh == 1 and kw == 1:
                        continue
                    t = kh * 3 + kw
                    shift = (kh - 1) * W + (kw - 1)
                    w_t = kcat_ref[t * C:(t + 1) * C, :]          # (16,16), sublane-aligned slice
                    tap = mm(w_t, pre_wide[:, halo + shift:halo + shift + M])
                    out = out + tap * mask_ref[t:t + 1, :]        # zero cross-row / cross-image taps
            return out

        # ---- P5 = C5_conv(C5) -------------------------------------------------
        p5 = mm(w5_ref[...], c5_ref[...])                          # (16, M5)
        p5_ref[...] = p5

        # ---- P4 = P4_conv( upsample(P5) + C4_conv(C4) ) -------------------------
        pre4 = mm(p5, u4_ref[...]) + mm(w4_ref[...], c4_ref[...])  # (16, M4 + 2*halo4)
        p4 = smooth3x3(pre4, k4_ref, m4_ref, H4, W4)
        p4_ref[...] = p4

        # ---- P3 = P3_conv( upsample(P4) + C3_conv(C3) ) -------------------------
        pre3 = mm(p4, u3_ref[...]) + mm(w3_ref[...], c3_ref[...])
        p3 = smooth3x3(pre3, k3_ref, m3_ref, H3, W3)
        p3_ref[...] = p3

        # ---- P2 = P2_conv( upsample(P3) + C2_conv(C2) ) -------------------------
        pre2 = mm(p3, u2_ref[...]) + mm(w2_ref[...], c2_ref[...])
        p2 = smooth3x3(pre2, k2_ref, m2_ref, H2, W2)
        p2_ref[...] = p2                                            # (16, N*H2*W2): lane-dense store

    return kernel


# ---------------------------------------------------------------------------
# Trace-time helpers (constants / layout plumbing built in the wrapper).
# ---------------------------------------------------------------------------
def _to_cm(x):
    """NCHW -> (C, N*H*W).  For N=1 this is a pure reshape (no data movement)."""
    n, c, h, w = x.shape
    return jnp.transpose(x, (1, 0, 2, 3)).reshape(c, n * h * w)


def _from_cm(y, n, h, w):
    """(C, N*H*W) -> NCHW.  For N=1 this is a pure reshape."""
    c = y.shape[0]
    return jnp.transpose(y.reshape(c, n, h, w), (1, 0, 2, 3))


def _interp_matrix(out_size, in_size):
    """1-D bilinear (align_corners=False) interpolation operator (out, in)."""
    scale = in_size / out_size
    s = (jnp.arange(out_size, dtype=jnp.float32) + 0.5) * scale - 0.5
    s = jnp.maximum(s, 0.0)
    i0 = jnp.minimum(jnp.floor(s).astype(jnp.int32), in_size - 1)
    i1 = jnp.minimum(i0 + 1, in_size - 1)
    frac = s - i0.astype(jnp.float32)
    m0 = jax.nn.one_hot(i0, in_size, dtype=jnp.float32) * (1.0 - frac)[:, None]
    m1 = jax.nn.one_hot(i1, in_size, dtype=jnp.float32) * frac[:, None]
    return m0 + m1


def _upsample_op(n, out_hw, in_hw, halo):
    """(N*ih*iw, N*oh*ow + 2*halo) right-multiply operator: maps a level's flat
    (16, M_in) map straight into the next level's halo-padded flat layout."""
    (oh, ow), (ih, iw) = out_hw, in_hw
    u = jnp.kron(_interp_matrix(oh, ih), _interp_matrix(ow, iw))   # (oh*ow, ih*iw)
    if n > 1:
        u = jnp.kron(jnp.eye(n, dtype=jnp.float32), u)
    return jnp.pad(u.T, ((0, 0), (halo, halo)))


def _tap_masks(n, h, w):
    """(9, N*h*w) 0/1 masks: 1 where tap t = kh*3 + kw stays inside the image."""
    m = jnp.arange(n * h * w, dtype=jnp.int32)
    col = m % w
    row = (m // w) % h
    rows = []
    for kh in range(3):
        for kw in range(3):
            dh, dw = kh - 1, kw - 1
            rows.append((row + dh >= 0) & (row + dh < h) &
                        (col + dw >= 0) & (col + dw < w))
    return jnp.stack(rows).astype(jnp.float32)


def _lateral_w(w_oihw):
    """(Cout, Cin, 1, 1) -> (Cout, Cin)."""
    return w_oihw.reshape(w_oihw.shape[0], w_oihw.shape[1])


def _smooth_w(w_oihw):
    """(Cout, Cin, 3, 3) -> (9*Cout, Cin), tap-major rows (t = kh*3 + kw)."""
    return jnp.transpose(w_oihw, (2, 3, 0, 1)).reshape(-1, w_oihw.shape[1])


# ---------------------------------------------------------------------------
# Public forward (NCHW in / NCHW out, PyTorch convention).
# ---------------------------------------------------------------------------
@jax.jit
def fpn_forward(params, C1, C2, C3, C4, C5):
    del C1  # unused by the reference forward
    N, _, H2, W2 = C2.shape
    _, _, H3, W3 = C3.shape
    _, _, H4, W4 = C4.shape
    _, _, H5, W5 = C5.shape
    C = LAYER_THICK
    halo4, halo3, halo2 = W4 + 1, W3 + 1, W2 + 1   # per-level lane halos

    kernel = _build_kernel(N, (H2, W2), (H3, W3), (H4, W4))

    out_shapes = (
        jax.ShapeDtypeStruct((C, N * H2 * W2), jnp.float32),
        jax.ShapeDtypeStruct((C, N * H3 * W3), jnp.float32),
        jax.ShapeDtypeStruct((C, N * H4 * W4), jnp.float32),
        jax.ShapeDtypeStruct((C, N * H5 * W5), jnp.float32),
    )

    pad_lanes = lambda x, h: jnp.pad(x, ((0, 0), (h, h)))

    p2, p3, p4, p5 = pl.pallas_call(
        kernel,
        out_shape=out_shapes,
    )(
        _to_cm(C5),
        pad_lanes(_to_cm(C4), halo4),
        pad_lanes(_to_cm(C3), halo3),
        pad_lanes(_to_cm(C2), halo2),
        _lateral_w(params["C5_conv"]), _lateral_w(params["C4_conv"]),
        _lateral_w(params["C3_conv"]), _lateral_w(params["C2_conv"]),
        _smooth_w(params["P4_conv"]), _smooth_w(params["P3_conv"]),
        _smooth_w(params["P2_conv"]),
        _upsample_op(N, (H4, W4), (H5, W5), halo4),
        _upsample_op(N, (H3, W3), (H4, W4), halo3),
        _upsample_op(N, (H2, W2), (H3, W3), halo2),
        _tap_masks(N, H4, W4), _tap_masks(N, H3, W3), _tap_masks(N, H2, W2),
    )
    return (_from_cm(p2, N, H2, W2), _from_cm(p3, N, H3, W3),
            _from_cm(p4, N, H4, W4), _from_cm(p5, N, H5, W5))


# ---------------------------------------------------------------------------
# Deterministic synthetic parameters (PyTorch (Cout, Cin, kh, kw) layout).
# ---------------------------------------------------------------------------
def init_fpn_params(key):
    keys = jax.random.split(key, 7)

    def w(k, cout, cin, ksz):
        return jax.random.normal(k, (cout, cin, ksz, ksz), jnp.float32) * 0.05

    return {
        "C5_conv": w(keys[0], LAYER_THICK, 512, 1),
        "C4_conv": w(keys[1], LAYER_THICK, 512, 1),
        "C3_conv": w(keys[2], LAYER_THICK, 256, 1),
        "C2_conv": w(keys[3], LAYER_THICK, 128, 1),
        "P2_conv": w(keys[4], LAYER_THICK, LAYER_THICK, 3),
        "P3_conv": w(keys[5], LAYER_THICK, LAYER_THICK, 3),
        "P4_conv": w(keys[6], LAYER_THICK, LAYER_THICK, 3),
    }


# ---------------------------------------------------------------------------
# Pure-JAX reference of the PyTorch module (for a runtime cross-check).
# ---------------------------------------------------------------------------
def _reference_forward(params, C2, C3, C4, C5):
    hp = jax.lax.Precision.HIGHEST

    def conv(x, w, pad):
        return jax.lax.conv_general_dilated(
            x, w, window_strides=(1, 1), padding=pad,
            dimension_numbers=("NCHW", "OIHW", "NCHW"), precision=hp)

    def upsample(x, oh, ow):
        _, _, H, W = x.shape

        def coords(out_size, in_size):
            s = (jnp.arange(out_size, dtype=jnp.float32) + 0.5) * (in_size / out_size) - 0.5
            s = jnp.maximum(s, 0.0)
            i0 = jnp.minimum(jnp.floor(s).astype(jnp.int32), in_size - 1)
            i1 = jnp.minimum(i0 + 1, in_size - 1)
            return i0, i1, s - i0.astype(jnp.float32)

        y0, y1, fy = coords(oh, H)
        x0, x1, fx = coords(ow, W)
        r0, r1 = x[:, :, y0, :], x[:, :, y1, :]
        v00, v01 = r0[:, :, :, x0], r0[:, :, :, x1]
        v10, v11 = r1[:, :, :, x0], r1[:, :, :, x1]
        fy_ = fy[None, None, :, None]
        fx_ = fx[None, None, None, :]
        top = v00 * (1 - fx_) + v01 * fx_
        bot = v10 * (1 - fx_) + v11 * fx_
        return top * (1 - fy_) + bot * fy_

    P5 = conv(C5, params["C5_conv"], "VALID")
    P4 = upsample(P5, C4.shape[2], C4.shape[3]) + conv(C4, params["C4_conv"], "VALID")
    P4 = conv(P4, params["P4_conv"], "SAME")
    P3 = upsample(P4, C3.shape[2], C3.shape[3]) + conv(C3, params["C3_conv"], "VALID")
    P3 = conv(P3, params["P3_conv"], "SAME")
    P2 = upsample(P3, C2.shape[2], C2.shape[3]) + conv(C2, params["C2_conv"], "VALID")
    P2 = conv(P2, params["P2_conv"], "SAME")
    return P2, P3, P4, P5


if __name__ == "__main__":
    key = jax.random.PRNGKey(0)
    kp, k1, k2, k3, k4, k5 = jax.random.split(key, 6)
    params = init_fpn_params(kp)

    N = 1
    C1 = jax.random.normal(k1, (N, 64, 32, 32), jnp.float32)   # unused by forward
    C2 = jax.random.normal(k2, (N, 128, 16, 16), jnp.float32)
    C3 = jax.random.normal(k3, (N, 256, 8, 8), jnp.float32)
    C4 = jax.random.normal(k4, (N, 512, 4, 4), jnp.float32)
    C5 = jax.random.normal(k5, (N, 512, 2, 2), jnp.float32)

    outs = fpn_forward(params, C1, C2, C3, C4, C5)
    jax.block_until_ready(outs)
    P2, P3, P4, P5 = outs

    assert P2.shape == (N, LAYER_THICK, 16, 16)
    assert P3.shape == (N, LAYER_THICK, 8, 8)
    assert P4.shape == (N, LAYER_THICK, 4, 4)
    assert P5.shape == (N, LAYER_THICK, 2, 2)

    # Cross-check against a pure-JAX reference of the PyTorch module
    # (tightened tolerance: all-f32 pipeline, expected error ~1e-5).
    refs = _reference_forward(params, C2, C3, C4, C5)
    for got, want in zip(outs, refs):
        err = float(jnp.max(jnp.abs(got - want)))
        assert err < 1e-3, f"mismatch vs reference: max abs err {err}"

    print("KERNEL_OK")
</pallas_src>

<mosaic_0001>
module attributes {stable_mosaic.version = 11 : i64} {
  func.func @kernel(%arg0: memref<512x4xf32, #tpu.memory_space<vmem>>, %arg1: memref<512x26xf32, #tpu.memory_space<vmem>>, %arg2: memref<256x82xf32, #tpu.memory_space<vmem>>, %arg3: memref<128x290xf32, #tpu.memory_space<vmem>>, %arg4: memref<16x512xf32, #tpu.memory_space<vmem>>, %arg5: memref<16x512xf32, #tpu.memory_space<vmem>>, %arg6: memref<16x256xf32, #tpu.memory_space<vmem>>, %arg7: memref<16x128xf32, #tpu.memory_space<vmem>>, %arg8: memref<144x16xf32, #tpu.memory_space<vmem>>, %arg9: memref<144x16xf32, #tpu.memory_space<vmem>>, %arg10: memref<144x16xf32, #tpu.memory_space<vmem>>, %arg11: memref<4x26xf32, #tpu.memory_space<vmem>>, %arg12: memref<16x82xf32, #tpu.memory_space<vmem>>, %arg13: memref<64x290xf32, #tpu.memory_space<vmem>>, %arg14: memref<9x16xf32, #tpu.memory_space<vmem>>, %arg15: memref<9x64xf32, #tpu.memory_space<vmem>>, %arg16: memref<9x256xf32, #tpu.memory_space<vmem>>, %arg17: memref<16x256xf32, #tpu.memory_space<vmem>>, %arg18: memref<16x64xf32, #tpu.memory_space<vmem>>, %arg19: memref<16x16xf32, #tpu.memory_space<vmem>>, %arg20: memref<16x4xf32, #tpu.memory_space<vmem>>) attributes {dimension_semantics = [], scalar_prefetch = 0 : i64, scratch_operands = 0 : i64, tpu.core_type = #tpu.core_type<tc>} {
    %c0 = arith.constant 0 : index
    %c0_0 = arith.constant 0 : index
    %0 = vector.load %arg4[%c0, %c0_0] : memref<16x512xf32, #tpu.memory_space<vmem>>, vector<16x512xf32>
    %c0_1 = arith.constant 0 : index
    %c0_2 = arith.constant 0 : index
    %1 = vector.load %arg0[%c0_1, %c0_2] : memref<512x4xf32, #tpu.memory_space<vmem>>, vector<512x4xf32>
    %cst = arith.constant dense<0.000000e+00> : vector<16x4xf32>
    %2 = tpu.matmul %0, %1, %cst {dimension_numbers = #tpu.dot_dimension_numbers<[1], [0], [0], [1], [0, 0, 1, 1], [], []>} : vector<16x512xf32>, vector<512x4xf32>, vector<16x4xf32> -> vector<16x4xf32>
    %c0_3 = arith.constant 0 : index
    %c0_4 = arith.constant 0 : index
    %3 = vector.load %arg20[%c0_3, %c0_4] : memref<16x4xf32, #tpu.memory_space<vmem>>, vector<16x4xf32>
    tpu.vector_store %arg20[%c0_3, %c0_4], %2 {strides = array<i32>} : memref<16x4xf32, #tpu.memory_space<vmem>>, vector<16x4xf32>,
    %c0_5 = arith.constant 0 : index
    %c0_6 = arith.constant 0 : index
    %4 = vector.load %arg11[%c0_5, %c0_6] : memref<4x26xf32, #tpu.memory_space<vmem>>, vector<4x26xf32>
    %cst_7 = arith.constant dense<0.000000e+00> : vector<16x26xf32>
    %5 = tpu.matmul %2, %4, %cst_7 {dimension_numbers = #tpu.dot_dimension_numbers<[1], [0], [0], [1], [0, 0, 1, 1], [], []>} : vector<16x4xf32>, vector<4x26xf32>, vector<16x26xf32> -> vector<16x26xf32>
    %c0_8 = arith.constant 0 : index
    %c0_9 = arith.constant 0 : index
    %6 = vector.load %arg5[%c0_8, %c0_9] : memref<16x512xf32, #tpu.memory_space<vmem>>, vector<16x512xf32>
    %c0_10 = arith.constant 0 : index
    %c0_11 = arith.constant 0 : index
    %7 = vector.load %arg1[%c0_10, %c0_11] : memref<512x26xf32, #tpu.memory_space<vmem>>, vector<512x26xf32>
    %cst_12 = arith.constant dense<0.000000e+00> : vector<16x26xf32>
    %8 = tpu.matmul %6, %7, %cst_12 {dimension_numbers = #tpu.dot_dimension_numbers<[1], [0], [0], [1], [0, 0, 1, 1], [], []>} : vector<16x512xf32>, vector<512x26xf32>, vector<16x26xf32> -> vector<16x26xf32>
    %9 = arith.addf %5, %8 : vector<16x26xf32>
    %c64 = arith.constant 64 : index
    %c0_13 = arith.constant 0 : index
    %10 = vector.load %arg8[%c64, %c0_13] : memref<144x16xf32, #tpu.memory_space<vmem>>, vector<16x16xf32>
    %11 = vector.extract_strided_slice %9 {offsets = [0, 5], sizes = [16, 16], strides = [1, 1]} : vector<16x26xf32> to vector<16x16xf32>
    %cst_14 = arith.constant dense<0.000000e+00> : vector<16x16xf32>
    %12 = tpu.matmul %10, %11, %cst_14 {dimension_numbers = #tpu.dot_dimension_numbers<[1], [0], [0], [1], [0, 0, 1, 1], [], []>} : vector<16x16xf32>, vector<16x16xf32>, vector<16x16xf32> -> vector<16x16xf32>
    %c0_15 = arith.constant 0 : index
    %c0_16 = arith.constant 0 : index
    %13 = vector.load %arg8[%c0_15, %c0_16] : memref<144x16xf32, #tpu.memory_space<vmem>>, vector<16x16xf32>
    %14 = vector.extract_strided_slice %9 {offsets = [0, 0], sizes = [16, 16], strides = [1, 1]} : vector<16x26xf32> to vector<16x16xf32>
    %cst_17 = arith.constant dense<0.000000e+00> : vector<16x16xf32>
    %15 = tpu.matmul %13, %14, %cst_17 {dimension_numbers = #tpu.dot_dimension_numbers<[1], [0], [0], [1], [0, 0, 1, 1], [], []>} : vector<16x16xf32>, vector<16x16xf32>, vector<16x16xf32> -> vector<16x16xf32>
    %c0_18 = arith.constant 0 : index
    %c0_19 = arith.constant 0 : index
    %16 = vector.load %arg14[%c0_18, %c0_19] : memref<9x16xf32, #tpu.memory_space<vmem>>, vector<1x16xf32>
    %17 = vector.broadcast %16 : vector<1x16xf32> to vector<16x16xf32>
    %18 = arith.mulf %15, %17 : vector<16x16xf32>
    %19 = arith.addf %12, %18 : vector<16x16xf32>
    %c16 = arith.constant 16 : index
    %c0_20 = arith.constant 0 : index
    %20 = vector.load %arg8[%c16, %c0_20] : memref<144x16xf32, #tpu.memory_space<vmem>>, vector<16x16xf32>
    %21 = vector.extract_strided_slice %9 {offsets = [0, 1], sizes = [16, 16], strides = [1, 1]} : vector<16x26xf32> to vector<16x16xf32>
    %cst_21 = arith.constant dense<0.000000e+00> : vector<16x16xf32>
    %22 = tpu.matmul %20, %21, %cst_21 {dimension_numbers = #tpu.dot_dimension_numbers<[1], [0], [0], [1], [0, 0, 1, 1], [], []>} : vector<16x16xf32>, vector<16x16xf32>, vector<16x16xf32> -> vector<16x16xf32>
    %c1 = arith.constant 1 : index
    %c0_22 = arith.constant 0 : index
    %23 = vector.load %arg14[%c1, %c0_22] : memref<9x16xf32, #tpu.memory_space<vmem>>, vector<1x16xf32>
    %24 = vector.broadcast %23 : vector<1x16xf32> to vector<16x16xf32>
    %25 = arith.mulf %22, %24 : vector<16x16xf32>
    %26 = arith.addf %19, %25 : vector<16x16xf32>
    %c32 = arith.constant 32 : index
    %c0_23 = arith.constant 0 : index
    %27 = vector.load %arg8[%c32, %c0_23] : memref<144x16xf32, #tpu.memory_space<vmem>>, vector<16x16xf32>
    %28 = vector.extract_strided_slice %9 {offsets = [0, 2], sizes = [16, 16], strides = [1, 1]} : vector<16x26xf32> to vector<16x16xf32>
    %cst_24 = arith.constant dense<0.000000e+00> : vector<16x16xf32>
    %29 = tpu.matmul %27, %28, %cst_24 {dimension_numbers = #tpu.dot_dimension_numbers<[1], [0], [0], [1], [0, 0, 1, 1], [], []>} : vector<16x16xf32>, vector<16x16xf32>, vector<16x16xf32> -> vector<16x16xf32>
    %c2 = arith.constant 2 : index
    %c0_25 = arith.constant 0 : index
    %30 = vector.load %arg14[%c2, %c0_25] : memref<9x16xf32, #tpu.memory_space<vmem>>, vector<1x16xf32>
    %31 = vector.broadcast %30 : vector<1x16xf32> to vector<16x16xf32>
    %32 = arith.mulf %29, %31 : vector<16x16xf32>
    %33 = arith.addf %26, %32 : vector<16x16xf32>
    %c48 = arith.constant 48 : index
    %c0_26 = arith.constant 0 : index
    %34 = vector.load %arg8[%c48, %c0_26] : memref<144x16xf32, #tpu.memory_space<vmem>>, vector<16x16xf32>
    %35 = vector.extract_strided_slice %9 {offsets = [0, 4], sizes = [16, 16], strides = [1, 1]} : vector<16x26xf32> to vector<16x16xf32>
    %cst_27 = arith.constant dense<0.000000e+00> : vector<16x16xf32>
    %36 = tpu.matmul %34, %35, %cst_27 {dimension_numbers = #tpu.dot_dimension_numbers<[1], [0], [0], [1], [0, 0, 1, 1], [], []>} : vector<16x16xf32>, vector<16x16xf32>, vector<16x16xf32> -> vector<16x16xf32>
    %c3 = arith.constant 3 : index
    %c0_28 = arith.constant 0 : index
    %37 = vector.load %arg14[%c3, %c0_28] : memref<9x16xf32, #tpu.memory_space<vmem>>, vector<1x16xf32>
    %38 = vector.broadcast %37 : vector<1x16xf32> to vector<16x16xf32>
    %39 = arith.mulf %36, %38 : vector<16x16xf32>
    %40 = arith.addf %33, %39 : vector<16x16xf32>
    %c80 = arith.constant 80 : index
    %c0_29 = arith.constant 0 : index
    %41 = vector.load %arg8[%c80, %c0_29] : memref<144x16xf32, #tpu.memory_space<vmem>>, vector<16x16xf32>
    %42 = vector.extract_strided_slice %9 {offsets = [0, 6], sizes = [16, 16], strides = [1, 1]} : vector<16x26xf32> to vector<16x16xf32>
    %cst_30 = arith.constant dense<0.000000e+00> : vector<16x16xf32>
    %43 = tpu.matmul %41, %42, %cst_30 {dimension_numbers = #tpu.dot_dimension_numbers<[1], [0], [0], [1], [0, 0, 1, 1], [], []>} : vector<16x16xf32>, vector<16x16xf32>, vector<16x16xf32> -> vector<16x16xf32>
    %c5 = arith.constant 5 : index
    %c0_31 = arith.constant 0 : index
    %44 = vector.load %arg14[%c5, %c0_31] : memref<9x16xf32, #tpu.memory_space<vmem>>, vector<1x16xf32>
    %45 = vector.broadcast %44 : vector<1x16xf32> to vector<16x16xf32>
    %46 = arith.mulf %43, %45 : vector<16x16xf32>
    %47 = arith.addf %40, %46 : vector<16x16xf32>
    %c96 = arith.constant 96 : index
    %c0_32 = arith.constant 0 : index
    %48 = vector.load %arg8[%c96, %c0_32] : memref<144x16xf32, #tpu.memory_space<vmem>>, vector<16x16xf32>
    %49 = vector.extract_strided_slice %9 {offsets = [0, 8], sizes = [16, 16], strides = [1, 1]} : vector<16x26xf32> to vector<16x16xf32>
    %cst_33 = arith.constant dense<0.000000e+00> : vector<16x16xf32>
    %50 = tpu.matmul %48, %49, %cst_33 {dimension_numbers = #tpu.dot_dimension_numbers<[1], [0], [0], [1], [0, 0, 1, 1], [], []>} : vector<16x16xf32>, vector<16x16xf32>, vector<16x16xf32> -> vector<16x16xf32>
    %c6 = arith.constant 6 : index
    %c0_34 = arith.constant 0 : index
    %51 = vector.load %arg14[%c6, %c0_34] : memref<9x16xf32, #tpu.memory_space<vmem>>, vector<1x16xf32>
    %52 = vector.broadcast %51 : vector<1x16xf32> to vector<16x16xf32>
    %53 = arith.mulf %50, %52 : vector<16x16xf32>
    %54 = arith.addf %47, %53 : vector<16x16xf32>
    %c112 = arith.constant 112 : index
    %c0_35 = arith.constant 0 : index
    %55 = vector.load %arg8[%c112, %c0_35] : memref<144x16xf32, #tpu.memory_space<vmem>>, vector<16x16xf32>
    %56 = vector.extract_strided_slice %9 {offsets = [0, 9], sizes = [16, 16], strides = [1, 1]} : vector<16x26xf32> to vector<16x16xf32>
    %cst_36 = arith.constant dense<0.000000e+00> : vector<16x16xf32>
    %57 = tpu.matmul %55, %56, %cst_36 {dimension_numbers = #tpu.dot_dimension_numbers<[1], [0], [0], [1], [0, 0, 1, 1], [], []>} : vector<16x16xf32>, vector<16x16xf32>, vector<16x16xf32> -> vector<16x16xf32>
    %c7 = arith.constant 7 : index
    %c0_37 = arith.constant 0 : index
    %58 = vector.load %arg14[%c7, %c0_37] : memref<9x16xf32, #tpu.memory_space<vmem>>, vector<1x16xf32>
    %59 = vector.broadcast %58 : vector<1x16xf32> to vector<16x16xf32>
    %60 = arith.mulf %57, %59 : vector<16x16xf32>
    %61 = arith.addf %54, %60 : vector<16x16xf32>
    %c128 = arith.constant 128 : index
    %c0_38 = arith.constant 0 : index
    %62 = vector.load %arg8[%c128, %c0_38] : memref<144x16xf32, #tpu.memory_space<vmem>>, vector<16x16xf32>
    %63 = vector.extract_strided_slice %9 {offsets = [0, 10], sizes = [16, 16], strides = [1, 1]} : vector<16x26xf32> to vector<16x16xf32>
    %cst_39 = arith.constant dense<0.000000e+00> : vector<16x16xf32>
    %64 = tpu.matmul %62, %63, %cst_39 {dimension_numbers = #tpu.dot_dimension_numbers<[1], [0], [0], [1], [0, 0, 1, 1], [], []>} : vector<16x16xf32>, vector<16x16xf32>, vector<16x16xf32> -> vector<16x16xf32>
    %c8 = arith.constant 8 : index
    %c0_40 = arith.constant 0 : index
    %65 = vector.load %arg14[%c8, %c0_40] : memref<9x16xf32, #tpu.memory_space<vmem>>, vector<1x16xf32>
    %66 = vector.broadcast %65 : vector<1x16xf32> to vector<16x16xf32>
    %67 = arith.mulf %64, %66 : vector<16x16xf32>
    %68 = arith.addf %61, %67 : vector<16x16xf32>
    %c0_41 = arith.constant 0 : index
    %c0_42 = arith.constant 0 : index
    %69 = vector.load %arg19[%c0_41, %c0_42] : memref<16x16xf32, #tpu.memory_space<vmem>>, vector<16x16xf32>
    tpu.vector_store %arg19[%c0_41, %c0_42], %68 {strides = array<i32>} : memref<16x16xf32, #tpu.memory_space<vmem>>, vector<16x16xf32>,
    %c0_43 = arith.constant 0 : index
    %c0_44 = arith.constant 0 : index
    %70 = vector.load %arg12[%c0_43, %c0_44] : memref<16x82xf32, #tpu.memory_space<vmem>>, vector<16x82xf32>
    %cst_45 = arith.constant dense<0.000000e+00> : vector<16x82xf32>
    %71 = tpu.matmul %68, %70, %cst_45 {dimension_numbers = #tpu.dot_dimension_numbers<[1], [0], [0], [1], [0, 0, 1, 1], [], []>} : vector<16x16xf32>, vector<16x82xf32>, vector<16x82xf32> -> vector<16x82xf32>
    %c0_46 = arith.constant 0 : index
    %c0_47 = arith.constant 0 : index
    %72 = vector.load %arg6[%c0_46, %c0_47] : memref<16x256xf32, #tpu.memory_space<vmem>>, vector<16x256xf32>
    %c0_48 = arith.constant 0 : index
    %c0_49 = arith.constant 0 : index
    %73 = vector.load %arg2[%c0_48, %c0_49] : memref<256x82xf32, #tpu.memory_space<vmem>>, vector<256x82xf32>
    %cst_50 = arith.constant dense<0.000000e+00> : vector<16x82xf32>
    %74 = tpu.matmul %72, %73, %cst_50 {dimension_numbers = #tpu.dot_dimension_numbers<[1], [0], [0], [1], [0, 0, 1, 1], [], []>} : vector<16x256xf32>, vector<256x82xf32>, vector<16x82xf32> -> vector<16x82xf32>
    %75 = arith.addf %71, %74 : vector<16x82xf32>
    %c64_51 = arith.constant 64 : index
    %c0_52 = arith.constant 0 : index
    %76 = vector.load %arg9[%c64_51, %c0_52] : memref<144x16xf32, #tpu.memory_space<vmem>>, vector<16x16xf32>
    %77 = vector.extract_strided_slice %75 {offsets = [0, 9], sizes = [16, 64], strides = [1, 1]} : vector<16x82xf32> to vector<16x64xf32>
    %cst_53 = arith.constant dense<0.000000e+00> : vector<16x64xf32>
    %78 = tpu.matmul %76, %77, %cst_53 {dimension_numbers = #tpu.dot_dimension_numbers<[1], [0], [0], [1], [0, 0, 1, 1], [], []>} : vector<16x16xf32>, vector<16x64xf32>, vector<16x64xf32> -> vector<16x64xf32>
    %c0_54 = arith.constant 0 : index
    %c0_55 = arith.constant 0 : index
    %79 = vector.load %arg9[%c0_54, %c0_55] : memref<144x16xf32, #tpu.memory_space<vmem>>, vector<16x16xf32>
    %80 = vector.extract_strided_slice %75 {offsets = [0, 0], sizes = [16, 64], strides = [1, 1]} : vector<16x82xf32> to vector<16x64xf32>
    %cst_56 = arith.constant dense<0.000000e+00> : vector<16x64xf32>
    %81 = tpu.matmul %79, %80, %cst_56 {dimension_numbers = #tpu.dot_dimension_numbers<[1], [0], [0], [1], [0, 0, 1, 1], [], []>} : vector<16x16xf32>, vector<16x64xf32>, vector<16x64xf32> -> vector<16x64xf32>
    %c0_57 = arith.constant 0 : index
    %c0_58 = arith.constant 0 : index
    %82 = vector.load %arg15[%c0_57, %c0_58] : memref<9x64xf32, #tpu.memory_space<vmem>>, vector<1x64xf32>
    %83 = vector.broadcast %82 : vector<1x64xf32> to vector<16x64xf32>
    %84 = arith.mulf %81, %83 : vector<16x64xf32>
    %85 = arith.addf %78, %84 : vector<16x64xf32>
    %c16_59 = arith.constant 16 : index
    %c0_60 = arith.constant 0 : index
    %86 = vector.load %arg9[%c16_59, %c0_60] : memref<144x16xf32, #tpu.memory_space<vmem>>, vector<16x16xf32>
    %87 = vector.extract_strided_slice %75 {offsets = [0, 1], sizes = [16, 64], strides = [1, 1]} : vector<16x82xf32> to vector<16x64xf32>
    %cst_61 = arith.constant dense<0.000000e+00> : vector<16x64xf32>
    %88 = tpu.matmul %86, %87, %cst_61 {dimension_numbers = #tpu.dot_dimension_numbers<[1], [0], [0], [1], [0, 0, 1, 1], [], []>} : vector<16x16xf32>, vector<16x64xf32>, vector<16x64xf32> -> vector<16x64xf32>
    %c1_62 = arith.constant 1 : index
    %c0_63 = arith.constant 0 : index
    %89 = vector.load %arg15[%c1_62, %c0_63] : memref<9x64xf32, #tpu.memory_space<vmem>>, vector<1x64xf32>
    %90 = vector.broadcast %89 : vector<1x64xf32> to vector<16x64xf32>
    %91 = arith.mulf %88, %90 : vector<16x64xf32>
    %92 = arith.addf %85, %91 : vector<16x64xf32>
    %c32_64 = arith.constant 32 : index
    %c0_65 = arith.constant 0 : index
    %93 = vector.load %arg9[%c32_64, %c0_65] : memref<144x16xf32, #tpu.memory_space<vmem>>, vector<16x16xf32>
    %94 = vector.extract_strided_slice %75 {offsets = [0, 2], sizes = [16, 64], strides = [1, 1]} : vector<16x82xf32> to vector<16x64xf32>
    %cst_66 = arith.constant dense<0.000000e+00> : vector<16x64xf32>
    %95 = tpu.matmul %93, %94, %cst_66 {dimension_numbers = #tpu.dot_dimension_numbers<[1], [0], [0], [1], [0, 0, 1, 1], [], []>} : vector<16x16xf32>, vector<16x64xf32>, vector<16x64xf32> -> vector<16x64xf32>
    %c2_67 = arith.constant 2 : index
    %c0_68 = arith.constant 0 : index
    %96 = vector.load %arg15[%c2_67, %c0_68] : memref<9x64xf32, #tpu.memory_space<vmem>>, vector<1x64xf32>
    %97 = vector.broadcast %96 : vector<1x64xf32> to vector<16x64xf32>
    %98 = arith.mulf %95, %97 : vector<16x64xf32>
    %99 = arith.addf %92, %98 : vector<16x64xf32>
    %c48_69 = arith.constant 48 : index
    %c0_70 = arith.constant 0 : index
    %100 = vector.load %arg9[%c48_69, %c0_70] : memref<144x16xf32, #tpu.memory_space<vmem>>, vector<16x16xf32>
    %101 = vector.extract_strided_slice %75 {offsets = [0, 8], sizes = [16, 64], strides = [1, 1]} : vector<16x82xf32> to vector<16x64xf32>
    %cst_71 = arith.constant dense<0.000000e+00> : vector<16x64xf32>
    %102 = tpu.matmul %100, %101, %cst_71 {dimension_numbers = #tpu.dot_dimension_numbers<[1], [0], [0], [1], [0, 0, 1, 1], [], []>} : vector<16x16xf32>, vector<16x64xf32>, vector<16x64xf32> -> vector<16x64xf32>
    %c3_72 = arith.constant 3 : index
    %c0_73 = arith.constant 0 : index
    %103 = vector.load %arg15[%c3_72, %c0_73] : memref<9x64xf32, #tpu.memory_space<vmem>>, vector<1x64xf32>
    %104 = vector.broadcast %103 : vector<1x64xf32> to vector<16x64xf32>
    %105 = arith.mulf %102, %104 : vector<16x64xf32>
    %106 = arith.addf %99, %105 : vector<16x64xf32>
    %c80_74 = arith.constant 80 : index
    %c0_75 = arith.constant 0 : index
    %107 = vector.load %arg9[%c80_74, %c0_75] : memref<144x16xf32, #tpu.memory_space<vmem>>, vector<16x16xf32>
    %108 = vector.extract_strided_slice %75 {offsets = [0, 10], sizes = [16, 64], strides = [1, 1]} : vector<16x82xf32> to vector<16x64xf32>
    %cst_76 = arith.constant dense<0.000000e+00> : vector<16x64xf32>
    %109 = tpu.matmul %107, %108, %cst_76 {dimension_numbers = #tpu.dot_dimension_numbers<[1], [0], [0], [1], [0, 0, 1, 1], [], []>} : vector<16x16xf32>, vector<16x64xf32>, vector<16x64xf32> -> vector<16x64xf32>
    %c5_77 = arith.constant 5 : index
    %c0_78 = arith.constant 0 : index
    %110 = vector.load %arg15[%c5_77, %c0_78] : memref<9x64xf32, #tpu.memory_space<vmem>>, vector<1x64xf32>
    %111 = vector.broadcast %110 : vector<1x64xf32> to vector<16x64xf32>
    %112 = arith.mulf %109, %111 : vector<16x64xf32>
    %113 = arith.addf %106, %112 : vector<16x64xf32>
    %c96_79 = arith.constant 96 : index
    %c0_80 = arith.constant 0 : index
    %114 = vector.load %arg9[%c96_79, %c0_80] : memref<144x16xf32, #tpu.memory_space<vmem>>, vector<16x16xf32>
    %115 = vector.extract_strided_slice %75 {offsets = [0, 16], sizes = [16, 64], strides = [1, 1]} : vector<16x82xf32> to vector<16x64xf32>
    %cst_81 = arith.constant dense<0.000000e+00> : vector<16x64xf32>
    %116 = tpu.matmul %114, %115, %cst_81 {dimension_numbers = #tpu.dot_dimension_numbers<[1], [0], [0], [1], [0, 0, 1, 1], [], []>} : vector<16x16xf32>, vector<16x64xf32>, vector<16x64xf32> -> vector<16x64xf32>
    %c6_82 = arith.constant 6 : index
    %c0_83 = arith.constant 0 : index
    %117 = vector.load %arg15[%c6_82, %c0_83] : memref<9x64xf32, #tpu.memory_space<vmem>>, vector<1x64xf32>
    %118 = vector.broadcast %117 : vector<1x64xf32> to vector<16x64xf32>
    %119 = arith.mulf %116, %118 : vector<16x64xf32>
    %120 = arith.addf %113, %119 : vector<16x64xf32>
    %c112_84 = arith.constant 112 : index
    %c0_85 = arith.constant 0 : index
    %121 = vector.load %arg9[%c112_84, %c0_85] : memref<144x16xf32, #tpu.memory_space<vmem>>, vector<16x16xf32>
    %122 = vector.extract_strided_slice %75 {offsets = [0, 17], sizes = [16, 64], strides = [1, 1]} : vector<16x82xf32> to vector<16x64xf32>
    %cst_86 = arith.constant dense<0.000000e+00> : vector<16x64xf32>
    %123 = tpu.matmul %121, %122, %cst_86 {dimension_numbers = #tpu.dot_dimension_numbers<[1], [0], [0], [1], [0, 0, 1, 1], [], []>} : vector<16x16xf32>, vector<16x64xf32>, vector<16x64xf32> -> vector<16x64xf32>
    %c7_87 = arith.constant 7 : index
    %c0_88 = arith.constant 0 : index
    %124 = vector.load %arg15[%c7_87, %c0_88] : memref<9x64xf32, #tpu.memory_space<vmem>>, vector<1x64xf32>
    %125 = vector.broadcast %124 : vector<1x64xf32> to vector<16x64xf32>
    %126 = arith.mulf %123, %125 : vector<16x64xf32>
    %127 = arith.addf %120, %126 : vector<16x64xf32>
    %c128_89 = arith.constant 128 : index
    %c0_90 = arith.constant 0 : index
    %128 = vector.load %arg9[%c128_89, %c0_90] : memref<144x16xf32, #tpu.memory_space<vmem>>, vector<16x16xf32>
    %129 = vector.extract_strided_slice %75 {offsets = [0, 18], sizes = [16, 64], strides = [1, 1]} : vector<16x82xf32> to vector<16x64xf32>
    %cst_91 = arith.constant dense<0.000000e+00> : vector<16x64xf32>
    %130 = tpu.matmul %128, %129, %cst_91 {dimension_numbers = #tpu.dot_dimension_numbers<[1], [0], [0], [1], [0, 0, 1, 1], [], []>} : vector<16x16xf32>, vector<16x64xf32>, vector<16x64xf32> -> vector<16x64xf32>
    %c8_92 = arith.constant 8 : index
    %c0_93 = arith.constant 0 : index
    %131 = vector.load %arg15[%c8_92, %c0_93] : memref<9x64xf32, #tpu.memory_space<vmem>>, vector<1x64xf32>
    %132 = vector.broadcast %131 : vector<1x64xf32> to vector<16x64xf32>
    %133 = arith.mulf %130, %132 : vector<16x64xf32>
    %134 = arith.addf %127, %133 : vector<16x64xf32>
    %c0_94 = arith.constant 0 : index
    %c0_95 = arith.constant 0 : index
    %135 = vector.load %arg18[%c0_94, %c0_95] : memref<16x64xf32, #tpu.memory_space<vmem>>, vector<16x64xf32>
    tpu.vector_store %arg18[%c0_94, %c0_95], %134 {strides = array<i32>} : memref<16x64xf32, #tpu.memory_space<vmem>>, vector<16x64xf32>,
    %c0_96 = arith.constant 0 : index
    %c0_97 = arith.constant 0 : index
    %136 = vector.load %arg13[%c0_96, %c0_97] : memref<64x290xf32, #tpu.memory_space<vmem>>, vector<64x290xf32>
    %cst_98 = arith.constant dense<0.000000e+00> : vector<16x290xf32>
    %137 = tpu.matmul %134, %136, %cst_98 {dimension_numbers = #tpu.dot_dimension_numbers<[1], [0], [0], [1], [0, 0, 1, 1], [], []>} : vector<16x64xf32>, vector<64x290xf32>, vector<16x290xf32> -> vector<16x290xf32>
    %c0_99 = arith.constant 0 : index
    %c0_100 = arith.constant 0 : index
    %138 = vector.load %arg7[%c0_99, %c0_100] : memref<16x128xf32, #tpu.memory_space<vmem>>, vector<16x128xf32>
    %c0_101 = arith.constant 0 : index
    %c0_102 = arith.constant 0 : index
    %139 = vector.load %arg3[%c0_101, %c0_102] : memref<128x290xf32, #tpu.memory_space<vmem>>, vector<128x290xf32>
    %cst_103 = arith.constant dense<0.000000e+00> : vector<16x290xf32>
    %140 = tpu.matmul %138, %139, %cst_103 {dimension_numbers = #tpu.dot_dimension_numbers<[1], [0], [0], [1], [0, 0, 1, 1], [], []>} : vector<16x128xf32>, vector<128x290xf32>, vector<16x290xf32> -> vector<16x290xf32>
    %141 = arith.addf %137, %140 : vector<16x290xf32>
    %c64_104 = arith.constant 64 : index
    %c0_105 = arith.constant 0 : index
    %142 = vector.load %arg10[%c64_104, %c0_105] : memref<144x16xf32, #tpu.memory_space<vmem>>, vector<16x16xf32>
    %143 = vector.extract_strided_slice %141 {offsets = [0, 17], sizes = [16, 256], strides = [1, 1]} : vector<16x290xf32> to vector<16x256xf32>
    %cst_106 = arith.constant dense<0.000000e+00> : vector<16x256xf32>
    %144 = tpu.matmul %142, %143, %cst_106 {dimension_numbers = #tpu.dot_dimension_numbers<[1], [0], [0], [1], [0, 0, 1, 1], [], []>} : vector<16x16xf32>, vector<16x256xf32>, vector<16x256xf32> -> vector<16x256xf32>
    %c0_107 = arith.constant 0 : index
    %c0_108 = arith.constant 0 : index
    %145 = vector.load %arg10[%c0_107, %c0_108] : memref<144x16xf32, #tpu.memory_space<vmem>>, vector<16x16xf32>
    %146 = vector.extract_strided_slice %141 {offsets = [0, 0], sizes = [16, 256], strides = [1, 1]} : vector<16x290xf32> to vector<16x256xf32>
    %cst_109 = arith.constant dense<0.000000e+00> : vector<16x256xf32>
    %147 = tpu.matmul %145, %146, %cst_109 {dimension_numbers = #tpu.dot_dimension_numbers<[1], [0], [0], [1], [0, 0, 1, 1], [], []>} : vector<16x16xf32>, vector<16x256xf32>, vector<16x256xf32> -> vector<16x256xf32>
    %c0_110 = arith.constant 0 : index
    %c0_111 = arith.constant 0 : index
    %148 = vector.load %arg16[%c0_110, %c0_111] : memref<9x256xf32, #tpu.memory_space<vmem>>, vector<1x256xf32>
    %149 = vector.broadcast %148 : vector<1x256xf32> to vector<16x256xf32>
    %150 = arith.mulf %147, %149 : vector<16x256xf32>
    %151 = arith.addf %144, %150 : vector<16x256xf32>
    %c16_112 = arith.constant 16 : index
    %c0_113 = arith.constant 0 : index
    %152 = vector.load %arg10[%c16_112, %c0_113] : memref<144x16xf32, #tpu.memory_space<vmem>>, vector<16x16xf32>
    %153 = vector.extract_strided_slice %141 {offsets = [0, 1], sizes = [16, 256], strides = [1, 1]} : vector<16x290xf32> to vector<16x256xf32>
    %cst_114 = arith.constant dense<0.000000e+00> : vector<16x256xf32>
    %154 = tpu.matmul %152, %153, %cst_114 {dimension_numbers = #tpu.dot_dimension_numbers<[1], [0], [0], [1], [0, 0, 1, 1], [], []>} : vector<16x16xf32>, vector<16x256xf32>, vector<16x256xf32> -> vector<16x256xf32>
    %c1_115 = arith.constant 1 : index
    %c0_116 = arith.constant 0 : index
    %155 = vector.load %arg16[%c1_115, %c0_116] : memref<9x256xf32, #tpu.memory_space<vmem>>, vector<1x256xf32>
    %156 = vector.broadcast %155 : vector<1x256xf32> to vector<16x256xf32>
    %157 = arith.mulf %154, %156 : vector<16x256xf32>
    %158 = arith.addf %151, %157 : vector<16x256xf32>
    %c32_117 = arith.constant 32 : index
    %c0_118 = arith.constant 0 : index
    %159 = vector.load %arg10[%c32_117, %c0_118] : memref<144x16xf32, #tpu.memory_space<vmem>>, vector<16x16xf32>
    %160 = vector.extract_strided_slice %141 {offsets = [0, 2], sizes = [16, 256], strides = [1, 1]} : vector<16x290xf32> to vector<16x256xf32>
    %cst_119 = arith.constant dense<0.000000e+00> : vector<16x256xf32>
    %161 = tpu.matmul %159, %160, %cst_119 {dimension_numbers = #tpu.dot_dimension_numbers<[1], [0], [0], [1], [0, 0, 1, 1], [], []>} : vector<16x16xf32>, vector<16x256xf32>, vector<16x256xf32> -> vector<16x256xf32>
    %c2_120 = arith.constant 2 : index
    %c0_121 = arith.constant 0 : index
    %162 = vector.load %arg16[%c2_120, %c0_121] : memref<9x256xf32, #tpu.memory_space<vmem>>, vector<1x256xf32>
    %163 = vector.broadcast %162 : vector<1x256xf32> to vector<16x256xf32>
    %164 = arith.mulf %161, %163 : vector<16x256xf32>
    %165 = arith.addf %158, %164 : vector<16x256xf32>
    %c48_122 = arith.constant 48 : index
    %c0_123 = arith.constant 0 : index
    %166 = vector.load %arg10[%c48_122, %c0_123] : memref<144x16xf32, #tpu.memory_space<vmem>>, vector<16x16xf32>
    %167 = vector.extract_strided_slice %141 {offsets = [0, 16], sizes = [16, 256], strides = [1, 1]} : vector<16x290xf32> to vector<16x256xf32>
    %cst_124 = arith.constant dense<0.000000e+00> : vector<16x256xf32>
    %168 = tpu.matmul %166, %167, %cst_124 {dimension_numbers = #tpu.dot_dimension_numbers<[1], [0], [0], [1], [0, 0, 1, 1], [], []>} : vector<16x16xf32>, vector<16x256xf32>, vector<16x256xf32> -> vector<16x256xf32>
    %c3_125 = arith.constant 3 : index
    %c0_126 = arith.constant 0 : index
    %169 = vector.load %arg16[%c3_125, %c0_126] : memref<9x256xf32, #tpu.memory_space<vmem>>, vector<1x256xf32>
    %170 = vector.broadcast %169 : vector<1x256xf32> to vector<16x256xf32>
    %171 = arith.mulf %168, %170 : vector<16x256xf32>
    %172 = arith.addf %165, %171 : vector<16x256xf32>
    %c80_127 = arith.constant 80 : index
    %c0_128 = arith.constant 0 : index
    %173 = vector.load %arg10[%c80_127, %c0_128] : memref<144x16xf32, #tpu.memory_space<vmem>>, vector<16x16xf32>
    %174 = vector.extract_strided_slice %141 {offsets = [0, 18], sizes = [16, 256], strides = [1, 1]} : vector<16x290xf32> to vector<16x256xf32>
    %cst_129 = arith.constant dense<0.000000e+00> : vector<16x256xf32>
    %175 = tpu.matmul %173, %174, %cst_129 {dimension_numbers = #tpu.dot_dimension_numbers<[1], [0], [0], [1], [0, 0, 1, 1], [], []>} : vector<16x16xf32>, vector<16x256xf32>, vector<16x256xf32> -> vector<16x256xf32>
    %c5_130 = arith.constant 5 : index
    %c0_131 = arith.constant 0 : index
    %176 = vector.load %arg16[%c5_130, %c0_131] : memref<9x256xf32, #tpu.memory_space<vmem>>, vector<1x256xf32>
    %177 = vector.broadcast %176 : vector<1x256xf32> to vector<16x256xf32>
    %178 = arith.mulf %175, %177 : vector<16x256xf32>
    %179 = arith.addf %172, %178 : vector<16x256xf32>
    %c96_132 = arith.constant 96 : index
    %c0_133 = arith.constant 0 : index
    %180 = vector.load %arg10[%c96_132, %c0_133] : memref<144x16xf32, #tpu.memory_space<vmem>>, vector<16x16xf32>
    %181 = vector.extract_strided_slice %141 {offsets = [0, 32], sizes = [16, 256], strides = [1, 1]} : vector<16x290xf32> to vector<16x256xf32>
    %cst_134 = arith.constant dense<0.000000e+00> : vector<16x256xf32>
    %182 = tpu.matmul %180, %181, %cst_134 {dimension_numbers = #tpu.dot_dimension_numbers<[1], [0], [0], [1], [0, 0, 1, 1], [], []>} : vector<16x16xf32>, vector<16x256xf32>, vector<16x256xf32> -> vector<16x256xf32>
    %c6_135 = arith.constant 6 : index
    %c0_136 = arith.constant 0 : index
    %183 = vector.load %arg16[%c6_135, %c0_136] : memref<9x256xf32, #tpu.memory_space<vmem>>, vector<1x256xf32>
    %184 = vector.broadcast %183 : vector<1x256xf32> to vector<16x256xf32>
    %185 = arith.mulf %182, %184 : vector<16x256xf32>
    %186 = arith.addf %179, %185 : vector<16x256xf32>
    %c112_137 = arith.constant 112 : index
    %c0_138 = arith.constant 0 : index
    %187 = vector.load %arg10[%c112_137, %c0_138] : memref<144x16xf32, #tpu.memory_space<vmem>>, vector<16x16xf32>
    %188 = vector.extract_strided_slice %141 {offsets = [0, 33], sizes = [16, 256], strides = [1, 1]} : vector<16x290xf32> to vector<16x256xf32>
    %cst_139 = arith.constant dense<0.000000e+00> : vector<16x256xf32>
    %189 = tpu.matmul %187, %188, %cst_139 {dimension_numbers = #tpu.dot_dimension_numbers<[1], [0], [0], [1], [0, 0, 1, 1], [], []>} : vector<16x16xf32>, vector<16x256xf32>, vector<16x256xf32> -> vector<16x256xf32>
    %c7_140 = arith.constant 7 : index
    %c0_141 = arith.constant 0 : index
    %190 = vector.load %arg16[%c7_140, %c0_141] : memref<9x256xf32, #tpu.memory_space<vmem>>, vector<1x256xf32>
    %191 = vector.broadcast %190 : vector<1x256xf32> to vector<16x256xf32>
    %192 = arith.mulf %189, %191 : vector<16x256xf32>
    %193 = arith.addf %186, %192 : vector<16x256xf32>
    %c128_142 = arith.constant 128 : index
    %c0_143 = arith.constant 0 : index
    %194 = vector.load %arg10[%c128_142, %c0_143] : memref<144x16xf32, #tpu.memory_space<vmem>>, vector<16x16xf32>
    %195 = vector.extract_strided_slice %141 {offsets = [0, 34], sizes = [16, 256], strides = [1, 1]} : vector<16x290xf32> to vector<16x256xf32>
    %cst_144 = arith.constant dense<0.000000e+00> : vector<16x256xf32>
    %196 = tpu.matmul %194, %195, %cst_144 {dimension_numbers = #tpu.dot_dimension_numbers<[1], [0], [0], [1], [0, 0, 1, 1], [], []>} : vector<16x16xf32>, vector<16x256xf32>, vector<16x256xf32> -> vector<16x256xf32>
    %c8_145 = arith.constant 8 : index
    %c0_146 = arith.constant 0 : index
    %197 = vector.load %arg16[%c8_145, %c0_146] : memref<9x256xf32, #tpu.memory_space<vmem>>, vector<1x256xf32>
    %198 = vector.broadcast %197 : vector<1x256xf32> to vector<16x256xf32>
    %199 = arith.mulf %196, %198 : vector<16x256xf32>
    %200 = arith.addf %193, %199 : vector<16x256xf32>
    %c0_147 = arith.constant 0 : index
    %c0_148 = arith.constant 0 : index
    %201 = vector.load %arg17[%c0_147, %c0_148] : memref<16x256xf32, #tpu.memory_space<vmem>>, vector<16x256xf32>
    tpu.vector_store %arg17[%c0_147, %c0_148], %200 {strides = array<i32>} : memref<16x256xf32, #tpu.memory_space<vmem>>, vector<16x256xf32>,
    return
  }
}

</mosaic_0001>

<bundles_post_ra>
// kernel: fpn_forward.1
= control target key start
LH: loop header
LB: loop body
LE: loop exit
PB: predicated region body
PF: predicated region fallthrough
CT: control target
= control target key end

     0   :  { %vm398_vm0 = vcmask 1043456   ;;  %vm224_vm1 = vcmask 31744   ;;  %s2629_s26 = smov 126   ;;  %s2630_s27 = smov 123   ;;  %vm429_vm2 = vcmask 130048   ;;  %vm1291_vm3 = vcmask 523264   ;;  %s3968_s0 = inlined_call_operand.vmem [shape: f32[512,4], index: 0, kind: input, shape index: {}]   ;;  %s3969_s4 = inlined_call_operand.vmem [shape: f32[16,512], index: 4, kind: input, shape index: {}]   ;;  %s3970_s1 = inlined_call_operand.vmem [shape: f32[512,26], index: 1, kind: input, shape index: {}]   ;;  %s3971_s5 = inlined_call_operand.vmem [shape: f32[16,512], index: 5, kind: input, shape index: {}]   ;;  %s3972_s11 = inlined_call_operand.vmem [shape: f32[4,26], index: 11, kind: input, shape index: {}]   ;;  %s3973_s20 = inlined_call_operand.vmem [shape: f32[16,4], index: 20, kind: output, shape index: {3}]   ;;  %s3974_s14 = inlined_call_operand.vmem [shape: f32[9,16], index: 14, kind: input, shape index: {}]   ;;  %s3975_s8 = inlined_call_operand.vmem [shape: f32[144,16], index: 8, kind: input, shape index: {}]   ;;  %s3976_s2 = inlined_call_operand.vmem [shape: f32[256,82], index: 2, kind: input, shape index: {}]   ;;  %s3977_s6 = inlined_call_operand.vmem [shape: f32[16,256], index: 6, kind: input, shape index: {}]   ;;  %s3978_s12 = inlined_call_operand.vmem [shape: f32[16,82], index: 12, kind: input, shape index: {}]   ;;  %s3979_s19 = inlined_call_operand.vmem [shape: f32[16,16], index: 19, kind: output, shape index: {2}]   ;;  %s3980_s15 = inlined_call_operand.vmem [shape: f32[9,64], index: 15, kind: input, shape index: {}]   ;;  %s3981_s9 = inlined_call_operand.vmem [shape: f32[144,16], index: 9, kind: input, shape index: {}]   ;;  %s3982_s3 = inlined_call_operand.vmem [shape: f32[128,290], index: 3, kind: input, shape index: {}]   ;;  %s3983_s7 = inlined_call_operand.vmem [shape: f32[16,128], index: 7, kind: input, shape index: {}]   ;;  %s3984_s13 = inlined_call_operand.vmem [shape: f32[64,290], index: 13, kind: input, shape index: {}]   ;;  %s3985_s18 = inlined_call_operand.vmem [shape: f32[16,64], index: 18, kind: output, shape index: {1}]   ;;  %s3986_s10 = inlined_call_operand.vmem [shape: f32[144,16], index: 10, kind: input, shape index: {}]   ;;  %s3987_s16 = inlined_call_operand.vmem [shape: f32[9,256], index: 16, kind: input, shape index: {}]   ;;  %s3988_s17 = inlined_call_operand.vmem [shape: f32[16,256], index: 17, kind: output, shape index: {0}]  }
   0x1   :  { %3993 = sst [smem:[#allocation2_spill]] %s3968_s0  ;;  %s2631_s28 = smov 120   ;;  %vm1671_vm4 = vcmask 1039360   ;;  %vm1596_vm5 = vcmask 908288   ;;  %vm1851_vm6 = vcmask 916480   ;;  %vm1761_vm7 = vcmask 1031168  }
   0x2   :  { %3994 = sst [smem:[#allocation3_spill]] %s3969_s4  ;;  %s2633_s29 = smov 127   ;;  %vm2031_vm8 = vcmask 785408   ;;  %vm1941_vm9 = vcmask 900096   ;;  %vm2211_vm10 = vcmask 769024   ;;  %vm2121_vm11 = vcmask 777216  }
   0x3   :  { %3995 = sst [smem:[#allocation4_spill]] %s3970_s1 }
   0x4   :  { %3996 = sst [smem:[#allocation5_spill]] %s3971_s5 }
   0x5   :  { %3997 = sst [smem:[#allocation6_spill]] %s3972_s11  ;;  %s2632_s11 = smov 124  }
   0x6   :  { %s3998_s23 = sld [smem:[#allocation2_spill]] }
   0x7   :  { %s3999_s4 = sld [smem:[#allocation3_spill]] }
   0x8   :  { %s4000_s21 = sld [smem:[#allocation4_spill]] }
   0x9   :  { %s4001_s22 = sld [smem:[#allocation5_spill]] }
   0xa   :  { %s4002_s30 = sld [smem:[#allocation6_spill]] }
   0xc   :  { %v115_v0 = vld [vmem:[%s3998_s23 + $0x178] sm:$0xff]  ;;  %v114_v1 = vld [vmem:[%s3998_s23 + $0x170] sm:$0xff]  ;;  %v113_v5 = vld [vmem:[%s3998_s23 + $0x168] sm:$0xff] }
   0xd   :  { %v131_v2 = vld [vmem:[%s3998_s23 + $0x1f8] sm:$0xff]  ;;  %178 = vmatpush.msra.mxu2 %v115_v0  ;;  %v130_v6 = vld [vmem:[%s3998_s23 + $0x1f0] sm:$0xff]  ;;  %v129_v9 = vld [vmem:[%s3998_s23 + $0x1e8] sm:$0xff] }
   0xe   :  { %201 = vmatpush.msra.mxu3 %v131_v2  ;;  %v83_v3 = vld [vmem:[%s3998_s23 + $0x78] sm:$0xff]  ;;  %v82_v7 = vld [vmem:[%s3998_s23 + $0x70] sm:$0xff]  ;;  %v81_v10 = vld [vmem:[%s3998_s23 + $0x68] sm:$0xff] }
   0xf   :  { %v99_v4 = vld [vmem:[%s3998_s23 + $0xf8] sm:$0xff]  ;;  %132 = vmatpush.msra.mxu0 %v83_v3  ;;  %v98_v8 = vld [vmem:[%s3998_s23 + $0xf0] sm:$0xff]  ;;  %179 = vmatpush.msra.mxu2 %v114_v1  ;;  %v112_v11 = vld [vmem:[%s3998_s23 + $0x160] sm:$0xff] }
  0x10   :  { %155 = vmatpush.msra.mxu1 %v99_v4  ;;  %202 = vmatpush.msra.mxu3 %v130_v6  ;;  %v97_v12 = vld [vmem:[%s3998_s23 + $0xe8] sm:$0xff]  ;;  %v128_v13 = vld [vmem:[%s3998_s23 + $0x1e0] sm:$0xff]  ;;  %v111_v16 = vld [vmem:[%s3998_s23 + $0x158] sm:$0xff] }
  0x11   :  { %133 = vmatpush.msra.mxu0 %v82_v7  ;;  %180 = vmatpush.msra.mxu2 %v113_v5  ;;  %v80_v14 = vld [vmem:[%s3998_s23 + $0x60] sm:$0xff]  ;;  %v127_v17 = vld [vmem:[%s3998_s23 + $0x1d8] sm:$0xff]  ;;  %v110_v20 = vld [vmem:[%s3998_s23 + $0x150] sm:$0xff] }
  0x12   :  { %156 = vmatpush.msra.mxu1 %v98_v8  ;;  %203 = vmatpush.msra.mxu3 %v129_v9  ;;  %v96_v15 = vld [vmem:[%s3998_s23 + $0xe0] sm:$0xff]  ;;  %v79_v18 = vld [vmem:[%s3998_s23 + $0x58] sm:$0xff]  ;;  %v126_v21 = vld [vmem:[%s3998_s23 + $0x1d0] sm:$0xff] }
  0x13   :  { %134 = vmatpush.msra.mxu0 %v81_v10  ;;  %181 = vmatpush.msra.mxu2 %v112_v11  ;;  %v95_v19 = vld [vmem:[%s3998_s23 + $0xd8] sm:$0xff]  ;;  %v78_v22 = vld [vmem:[%s3998_s23 + $0x50] sm:$0xff]  ;;  %v109_v24 = vld [vmem:[%s3998_s23 + $0x148] sm:$0xff] }
  0x14   :  { %157 = vmatpush.msra.mxu1 %v97_v12  ;;  %204 = vmatpush.msra.mxu3 %v128_v13  ;;  %v94_v23 = vld [vmem:[%s3998_s23 + $0xd0] sm:$0xff]  ;;  %v125_v25 = vld [vmem:[%s3998_s23 + $0x1c8] sm:$0xff]  ;;  %v108_v28 = vld [vmem:[%s3998_s23 + $0x140] sm:$0xff] }
  0x15   :  { %135 = vmatpush.msra.mxu0 %v80_v14  ;;  %182 = vmatpush.msra.mxu2 %v111_v16  ;;  %v77_v26 = vld [vmem:[%s3998_s23 + $0x48] sm:$0xff]  ;;  %v124_v29 = vld [vmem:[%s3998_s23 + $0x1c0] sm:$0xff]  ;;  %v107_v32 = vld [vmem:[%s3998_s23 + $0x138] sm:$0xff] }
  0x16   :  { %158 = vmatpush.msra.mxu1 %v96_v15  ;;  %205 = vmatpush.msra.mxu3 %v127_v17  ;;  %v93_v27 = vld [vmem:[%s3998_s23 + $0xc8] sm:$0xff]  ;;  %v76_v30 = vld [vmem:[%s3998_s23 + $0x40] sm:$0xff]  ;;  %v123_v33 = vld [vmem:[%s3998_s23 + $0x1b8] sm:$0xff] }
  0x17   :  { %136 = vmatpush.msra.mxu0 %v79_v18  ;;  %183 = vmatpush.msra.mxu2 %v110_v20  ;;  %v92_v31 = vld [vmem:[%s3998_s23 + $0xc0] sm:$0xff]  ;;  %v75_v34 = vld [vmem:[%s3998_s23 + $0x38] sm:$0xff]  ;;  %v106_v36 = vld [vmem:[%s3998_s23 + $0x130] sm:$0xff] }
  0x18   :  { %159 = vmatpush.msra.mxu1 %v95_v19  ;;  %206 = vmatpush.msra.mxu3 %v126_v21  ;;  %v91_v35 = vld [vmem:[%s3998_s23 + $0xb8] sm:$0xff]  ;;  %v122_v37 = vld [vmem:[%s3998_s23 + $0x1b0] sm:$0xff]  ;;  %v105_v40 = vld [vmem:[%s3998_s23 + $0x128] sm:$0xff] }
  0x19   :  { %137 = vmatpush.msra.mxu0 %v78_v22  ;;  %184 = vmatpush.msra.mxu2 %v109_v24  ;;  %v74_v38 = vld [vmem:[%s3998_s23 + $0x30] sm:$0xff]  ;;  %v121_v41 = vld [vmem:[%s3998_s23 + $0x1a8] sm:$0xff]  ;;  %v104_v44 = vld [vmem:[%s3998_s23 + $0x120] sm:$0xff] }
  0x1a   :  { %160 = vmatpush.msra.mxu1 %v94_v23  ;;  %207 = vmatpush.msra.mxu3 %v125_v25  ;;  %v90_v39 = vld [vmem:[%s3998_s23 + $0xb0] sm:$0xff]  ;;  %v73_v42 = vld [vmem:[%s3998_s23 + $0x28] sm:$0xff]  ;;  %v120_v45 = vld [vmem:[%s3998_s23 + $0x1a0] sm:$0xff] }
  0x1b   :  { %138 = vmatpush.msra.mxu0 %v77_v26  ;;  %185 = vmatpush.msra.mxu2 %v108_v28  ;;  %v89_v43 = vld [vmem:[%s3998_s23 + $0xa8] sm:$0xff]  ;;  %v72_v46 = vld [vmem:[%s3998_s23 + $0x20] sm:$0xff]  ;;  %v103_v48 = vld [vmem:[%s3998_s23 + $0x118] sm:$0xff] }
  0x1c   :  { %161 = vmatpush.msra.mxu1 %v93_v27  ;;  %208 = vmatpush.msra.mxu3 %v124_v29  ;;  %v88_v47 = vld [vmem:[%s3998_s23 + $0xa0] sm:$0xff]  ;;  %v119_v49 = vld [vmem:[%s3998_s23 + $0x198] sm:$0xff]  ;;  %v102_v52 = vld [vmem:[%s3998_s23 + $0x110] sm:$0xff] }
  0x1d   :  { %139 = vmatpush.msra.mxu0 %v76_v30  ;;  %186 = vmatpush.msra.mxu2 %v107_v32  ;;  %v71_v50 = vld [vmem:[%s3998_s23 + $0x18] sm:$0xff]  ;;  %v118_v53 = vld [vmem:[%s3998_s23 + $0x190] sm:$0xff]  ;;  %v101_v56 = vld [vmem:[%s3998_s23 + $0x108] sm:$0xff] }
  0x1e   :  { %162 = vmatpush.msra.mxu1 %v92_v31  ;;  %209 = vmatpush.msra.mxu3 %v123_v33  ;;  %v87_v51 = vld [vmem:[%s3998_s23 + $0x98] sm:$0xff]  ;;  %v70_v54 = vld [vmem:[%s3998_s23 + $0x10] sm:$0xff]  ;;  %v117_v57 = vld [vmem:[%s3998_s23 + $0x188] sm:$0xff] }
  0x1f   :  { %140 = vmatpush.msra.mxu0 %v75_v34  ;;  %187 = vmatpush.msra.mxu2 %v106_v36  ;;  %v86_v55 = vld [vmem:[%s3998_s23 + $0x90] sm:$0xff]  ;;  %v69_v58 = vld [vmem:[%s3998_s23 + $0x8] sm:$0xff]  ;;  %v100_v60 = vld [vmem:[%s3998_s23 + $0x100] sm:$0xff] }
  0x20   :  { %163 = vmatpush.msra.mxu1 %v91_v35  ;;  %210 = vmatpush.msra.mxu3 %v122_v37  ;;  %v85_v59 = vld [vmem:[%s3998_s23 + $0x88] sm:$0xff]  ;;  %v116_v61 = vld [vmem:[%s3998_s23 + $0x180] sm:$0xff]  ;;  %v62_v62 = vld [vmem:[%s3999_s4 + $0x10] sm:$0xff] }
  0x21   :  { %141 = vmatpush.msra.mxu0 %v74_v38  ;;  %188 = vmatpush.msra.mxu2 %v105_v40  ;;  %v63_v63 = vld [vmem:[%s3999_s4 + $0x18] sm:$0xff]  ;;  %v68_v0 = vld [vmem:[%s3998_s23] sm:$0xff]  ;;  %v61_v3 = vld [vmem:[%s3999_s4 + $0x8] sm:$0xff] }
  0x22   :  { %164 = vmatpush.msra.mxu1 %v90_v39  ;;  %211 = vmatpush.msra.mxu3 %v121_v41  ;;  %v84_v1 = vld [vmem:[%s3998_s23 + $0x80] sm:$0xff]  ;;  %v251_v4 = vld [vmem:[%s4000_s21 + $0x78] sm:$0xff]  ;;  %v250_v8 = vld [vmem:[%s4000_s21 + $0x70] sm:$0xff] }
  0x23   :  { %142 = vmatpush.msra.mxu0 %v73_v42  ;;  %189 = vmatpush.msra.mxu2 %v104_v44  ;;  %v60_v2 = vld [vmem:[%s3999_s4] sm:$0xff]  ;;  %v283_v5 = vld [vmem:[%s4000_s21 + $0x178] sm:$0xff]  ;;  %v282_v9 = vld [vmem:[%s4000_s21 + $0x170] sm:$0xff] }
  0x24   :  { %165 = vmatpush.msra.mxu1 %v89_v43  ;;  %212 = vmatpush.msra.mxu3 %v120_v45  ;;  %v299_v6 = vld [vmem:[%s4000_s21 + $0x1f8] sm:$0xff]  ;;  %v298_v10 = vld [vmem:[%s4000_s21 + $0x1f0] sm:$0xff]  ;;  %v249_v12 = vld [vmem:[%s4000_s21 + $0x68] sm:$0xff] }
  0x25   :  { %143 = vmatpush.msra.mxu0 %v72_v46  ;;  %190 = vmatpush.msra.mxu2 %v103_v48  ;;  %v267_v7 = vld [vmem:[%s4000_s21 + $0xf8] sm:$0xff]  ;;  %v266_v11 = vld [vmem:[%s4000_s21 + $0xf0] sm:$0xff]  ;;  %v281_v13 = vld [vmem:[%s4000_s21 + $0x168] sm:$0xff] }
  0x26   :  { %166 = vmatpush.msra.mxu1 %v88_v47  ;;  %213 = vmatpush.msra.mxu3 %v119_v49  ;;  %v66_v14 = vld [vmem:[%s3999_s4 + $0x30] sm:$0xff]  ;;  %v67_v15 = vld [vmem:[%s3999_s4 + $0x38] sm:$0xff]  ;;  %v248_v16 = vld [vmem:[%s4000_s21 + $0x60] sm:$0xff] }
  0x27   :  { %144 = vmatpush.msra.mxu0 %v71_v50  ;;  %191 = vmatpush.msra.mxu2 %v102_v52  ;;  %v280_v17 = vld [vmem:[%s4000_s21 + $0x160] sm:$0xff]  ;;  %v65_v19 = vld [vmem:[%s3999_s4 + $0x28] sm:$0xff]  ;;  %v247_v20 = vld [vmem:[%s4000_s21 + $0x58] sm:$0xff] }
  0x28   :  { %167 = vmatpush.msra.mxu1 %v87_v51  ;;  %214 = vmatpush.msra.mxu3 %v118_v53  ;;  %v64_v18 = vld [vmem:[%s3999_s4 + $0x20] sm:$0xff]  ;;  %v297_v21 = vld [vmem:[%s4000_s21 + $0x1e8] sm:$0xff]  ;;  %v279_v23 = vld [vmem:[%s4000_s21 + $0x158] sm:$0xff]  ;;  %s2634_s4 = smov 118  }
  0x29   :  { %145 = vmatpush.msra.mxu0 %v70_v54  ;;  %192 = vmatpush.msra.mxu2 %v101_v56  ;;  %v265_v22 = vld [vmem:[%s4000_s21 + $0xe8] sm:$0xff]  ;;  %v246_v24 = vld [vmem:[%s4000_s21 + $0x50] sm:$0xff]  ;;  %v296_v25 = vld [vmem:[%s4000_s21 + $0x1e0] sm:$0xff] }
  0x2a   :  { %168 = vmatpush.msra.mxu1 %v86_v55  ;;  %215 = vmatpush.msra.mxu3 %v117_v57  ;;  %v264_v26 = vld [vmem:[%s4000_s21 + $0xe0] sm:$0xff]  ;;  %v278_v27 = vld [vmem:[%s4000_s21 + $0x150] sm:$0xff]  ;;  %v245_v28 = vld [vmem:[%s4000_s21 + $0x48] sm:$0xff] }
  0x2b   :  { %146 = vmatpush.msra.mxu0 %v69_v58  ;;  %193 = vmatpush.msra.mxu2 %v100_v60  ;;  %v295_v29 = vld [vmem:[%s4000_s21 + $0x1d8] sm:$0xff]  ;;  %v277_v31 = vld [vmem:[%s4000_s21 + $0x148] sm:$0xff]  ;;  %v244_v32 = vld [vmem:[%s4000_s21 + $0x40] sm:$0xff] }
  0x2c   :  { %169 = vmatpush.msra.mxu1 %v85_v59  ;;  %216 = vmatpush.msra.mxu3 %v116_v61  ;;  %v263_v30 = vld [vmem:[%s4000_s21 + $0xd8] sm:$0xff]  ;;  %v294_v33 = vld [vmem:[%s4000_s21 + $0x1d0] sm:$0xff]  ;;  %v276_v35 = vld [vmem:[%s4000_s21 + $0x140] sm:$0xff] }
  0x2d   :  { %194 = vmatmul.f32.vlgmr.msra.gmra.mxu2 %v62_v62  ;;  %217 = vmatmul.f32.vlgmr.msra.gmra.mxu3 %v63_v63  ;;  %v262_v34 = vld [vmem:[%s4000_s21 + $0xd0] sm:$0xff]  ;;  %v243_v36 = vld [vmem:[%s4000_s21 + $0x38] sm:$0xff]  ;;  %v293_v37 = vld [vmem:[%s4000_s21 + $0x1c8] sm:$0xff] }
  0x2e   :  { %147 = vmatpush.msra.mxu0 %v68_v0  ;;  %170 = vmatpush.msra.mxu1 %v84_v1  ;;  %v261_v38 = vld [vmem:[%s4000_s21 + $0xc8] sm:$0xff]  ;;  %v275_v39 = vld [vmem:[%s4000_s21 + $0x138] sm:$0xff]  ;;  %v242_v40 = vld [vmem:[%s4000_s21 + $0x30] sm:$0xff] }
  0x2f   :  { %148 = vmatmul.f32.vlgmr.msra.gmra.mxu0 %v60_v2  ;;  %171 = vmatmul.f32.vlgmr.msra.gmra.mxu1 %v61_v3  ;;  %v292_v41 = vld [vmem:[%s4000_s21 + $0x1c0] sm:$0xff]  ;;  %v274_v43 = vld [vmem:[%s4000_s21 + $0x130] sm:$0xff]  ;;  %v241_v44 = vld [vmem:[%s4000_s21 + $0x28] sm:$0xff] }
  0x30   :  { %300 = vmatpush.msrb.mxu0 %v251_v4  ;;  %346 = vmatpush.msrb.mxu2 %v283_v5  ;;  %v260_v42 = vld [vmem:[%s4000_s21 + $0xc0] sm:$0xff]  ;;  %v291_v45 = vld [vmem:[%s4000_s21 + $0x1b8] sm:$0xff]  ;;  %v273_v47 = vld [vmem:[%s4000_s21 + $0x128] sm:$0xff] }
  0x31   :  { %369 = vmatpush.msrb.mxu3 %v299_v6  ;;  %323 = vmatpush.msrb.mxu1 %v267_v7  ;;  %v259_v46 = vld [vmem:[%s4000_s21 + $0xb8] sm:$0xff]  ;;  %v240_v48 = vld [vmem:[%s4000_s21 + $0x20] sm:$0xff]  ;;  %v290_v49 = vld [vmem:[%s4000_s21 + $0x1b0] sm:$0xff] }
  0x32   :  { %301 = vmatpush.msrb.mxu0 %v250_v8  ;;  %347 = vmatpush.msrb.mxu2 %v282_v9  ;;  %v258_v50 = vld [vmem:[%s4000_s21 + $0xb0] sm:$0xff]  ;;  %v272_v51 = vld [vmem:[%s4000_s21 + $0x120] sm:$0xff]  ;;  %v239_v52 = vld [vmem:[%s4000_s21 + $0x18] sm:$0xff] }
  0x33   :  { %370 = vmatpush.msrb.mxu3 %v298_v10  ;;  %324 = vmatpush.msrb.mxu1 %v266_v11  ;;  %v289_v53 = vld [vmem:[%s4000_s21 + $0x1a8] sm:$0xff]  ;;  %v271_v55 = vld [vmem:[%s4000_s21 + $0x118] sm:$0xff]  ;;  %v238_v56 = vld [vmem:[%s4000_s21 + $0x10] sm:$0xff] }
  0x34   :  { %302 = vmatpush.msrb.mxu0 %v249_v12  ;;  %348 = vmatpush.msrb.mxu2 %v281_v13  ;;  %v257_v54 = vld [vmem:[%s4000_s21 + $0xa8] sm:$0xff]  ;;  %v288_v57 = vld [vmem:[%s4000_s21 + $0x1a0] sm:$0xff]  ;;  %v270_v59 = vld [vmem:[%s4000_s21 + $0x110] sm:$0xff] }
  0x35   :  { %197 = vmatmul.f32.gmra.mxu2 %v66_v14  ;;  %220 = vmatmul.f32.gmra.mxu3 %v67_v15  ;;  %v256_v58 = vld [vmem:[%s4000_s21 + $0xa0] sm:$0xff]  ;;  %v237_v60 = vld [vmem:[%s4000_s21 + $0x8] sm:$0xff]  ;;  %v287_v61 = vld [vmem:[%s4000_s21 + $0x198] sm:$0xff] }
  0x36   :  { %303 = vmatpush.msrb.mxu0 %v248_v16  ;;  %349 = vmatpush.msrb.mxu2 %v280_v17  ;;  %v255_v62 = vld [vmem:[%s4000_s21 + $0x98] sm:$0xff]  ;;  %v269_v63 = vld [vmem:[%s4000_s21 + $0x108] sm:$0xff]  ;;  %v236_v0 = vld [vmem:[%s4000_s21] sm:$0xff] }
  0x37   :  { %151 = vmatmul.f32.gmra.mxu0 %v64_v18  ;;  %174 = vmatmul.f32.gmra.mxu1 %v65_v19  ;;  %v286_v1 = vld [vmem:[%s4000_s21 + $0x190] sm:$0xff]  ;;  %v228_v2 = vld [vmem:[%s4001_s22] sm:$0xff]  ;;  %v285_v5 = vld [vmem:[%s4000_s21 + $0x188] sm:$0xff] }
  0x38   :  { %304 = vmatpush.msrb.mxu0 %v247_v20  ;;  %371 = vmatpush.msrb.mxu3 %v297_v21  ;;  %v254_v3 = vld [vmem:[%s4000_s21 + $0x90] sm:$0xff]  ;;  %v268_v4 = vld [vmem:[%s4000_s21 + $0x100] sm:$0xff]  ;;  %v253_v7 = vld [vmem:[%s4000_s21 + $0x88] sm:$0xff] }
  0x39   :  { %325 = vmatpush.msrb.mxu1 %v265_v22  ;;  %350 = vmatpush.msrb.mxu2 %v279_v23  ;;  %v230_v6 = vld [vmem:[%s4001_s22 + $0x10] sm:$0xff]  ;;  %v284_v8 = vld [vmem:[%s4000_s21 + $0x180] sm:$0xff]  ;;  %v231_v9 = vld [vmem:[%s4001_s22 + $0x18] sm:$0xff] }
  0x3a   :  { %305 = vmatpush.msrb.mxu0 %v246_v24  ;;  %372 = vmatpush.msrb.mxu3 %v296_v25  ;;  %v232_v10 = vld [vmem:[%s4001_s22 + $0x20] sm:$0xff]  ;;  %v229_v12 = vld [vmem:[%s4001_s22 + $0x8] sm:$0xff]  ;;  %v234_v13 = vld [vmem:[%s4001_s22 + $0x30] sm:$0xff] }
  0x3b   :  { %326 = vmatpush.msrb.mxu1 %v264_v26  ;;  %351 = vmatpush.msrb.mxu2 %v278_v27  ;;  %v252_v11 = vld [vmem:[%s4000_s21 + $0x80] sm:$0xff]  ;;  %v235_v15 = vld [vmem:[%s4001_s22 + $0x38] sm:$0xff]  ;;  %v233_v16 = vld [vmem:[%s4001_s22 + $0x28] sm:$0xff] }
  0x3c   :  { %306 = vmatpush.msrb.mxu0 %v245_v28  ;;  %373 = vmatpush.msrb.mxu3 %v295_v29  ;;  %v227_v14 = vld [vmem:[%s4002_s30] sm:$0xf]  ;;  %s2635_s30 = smov 119  }
  0x3d   :  { %327 = vmatpush.msrb.mxu1 %v263_v30  ;;  %352 = vmatpush.msrb.mxu2 %v277_v31 }
  0x3e   :  { %307 = vmatpush.msrb.mxu0 %v244_v32  ;;  %374 = vmatpush.msrb.mxu3 %v294_v33 }
  0x3f   :  { %328 = vmatpush.msrb.mxu1 %v262_v34  ;;  %353 = vmatpush.msrb.mxu2 %v276_v35 }
  0x40   :  { %308 = vmatpush.msrb.mxu0 %v243_v36  ;;  %375 = vmatpush.msrb.mxu3 %v293_v37 }
  0x41   :  { %329 = vmatpush.msrb.mxu1 %v261_v38  ;;  %354 = vmatpush.msrb.mxu2 %v275_v39 }
  0x42   :  { %309 = vmatpush.msrb.mxu0 %v242_v40  ;;  %376 = vmatpush.msrb.mxu3 %v292_v41 }
  0x43   :  { %330 = vmatpush.msrb.mxu1 %v260_v42  ;;  %355 = vmatpush.msrb.mxu2 %v274_v43 }
  0x44   :  { %310 = vmatpush.msrb.mxu0 %v241_v44  ;;  %377 = vmatpush.msrb.mxu3 %v291_v45 }
  0x45   :  { %331 = vmatpush.msrb.mxu1 %v259_v46  ;;  %356 = vmatpush.msrb.mxu2 %v273_v47 }
  0x46   :  { %311 = vmatpush.msrb.mxu0 %v240_v48  ;;  %378 = vmatpush.msrb.mxu3 %v290_v49 }
  0x47   :  { %332 = vmatpush.msrb.mxu1 %v258_v50  ;;  %357 = vmatpush.msrb.mxu2 %v272_v51  ;;  %v427_v50 = vld [vmem:[%s3975_s8] sm:$0xff]  ;;  %v428_v51 = vld [vmem:[%s3975_s8 + $0x8] sm:$0xff] }
  0x48   :  { %312 = vmatpush.msrb.mxu0 %v239_v52  ;;  %379 = vmatpush.msrb.mxu3 %v289_v53 }
  0x49   :  { %333 = vmatpush.msrb.mxu1 %v257_v54  ;;  %358 = vmatpush.msrb.mxu2 %v271_v55 }
  0x4a   :  { %313 = vmatpush.msrb.mxu0 %v238_v56  ;;  %380 = vmatpush.msrb.mxu3 %v288_v57 }
  0x4b   :  { %334 = vmatpush.msrb.mxu1 %v256_v58  ;;  %359 = vmatpush.msrb.mxu2 %v270_v59  ;;  %v543_v58 = vld [vmem:[%s3975_s8 + $0x20] sm:$0xff] }
  0x4c   :  { %314 = vmatpush.msrb.mxu0 %v237_v60  ;;  %381 = vmatpush.msrb.mxu3 %v287_v61  ;;  %v425_v60 = vld [vmem:[%s3975_s8 + $0x40] sm:$0xff] }
  0x4d   :  { %335 = vmatpush.msrb.mxu1 %v255_v62  ;;  %360 = vmatpush.msrb.mxu2 %v269_v63 }
  0x4e   :  { %315 = vmatpush.msrb.mxu0 %v236_v0  ;;  %382 = vmatpush.msrb.mxu3 %v286_v1  ;;  %v824_v0 = vld [vmem:[%s3976_s2 + $0x78] sm:$0xff] }
  0x4f   :  { %316 = vmatmul.f32.vlgmr.msrb.gmra.mxu0 %v228_v2  ;;  %336 = vmatpush.msrb.mxu1 %v254_v3 }
  0x50   :  { %361 = vmatpush.msrb.mxu2 %v268_v4  ;;  %383 = vmatpush.msrb.mxu3 %v285_v5 }
  0x51   :  { %362 = vmatmul.f32.vlgmr.msrb.gmra.mxu2 %v230_v6  ;;  %337 = vmatpush.msrb.mxu1 %v253_v7  ;;  %v586_v6 = vld [vmem:[%s3975_s8 + $0x30] sm:$0xff] }
  0x52   :  { %384 = vmatpush.msrb.mxu3 %v284_v8  ;;  %2307 = vmatpush.msk.msra.mxu0 %vm398_vm0, %v227_v14  ;;  %v426_v8 = vld [vmem:[%s3975_s8 + $0x48] sm:$0xff] }
  0x53   :  { %385 = vmatmul.f32.vlgmr.msrb.gmra.mxu3 %v231_v9  ;;  %338 = vmatpush.msrb.mxu1 %v252_v11  ;;  %v500_v9 = vld [vmem:[%s3975_s8 + $0x10] sm:$0xff] }
  0x54   :  { %339 = vmatmul.f32.vlgmr.msrb.gmra.mxu1 %v229_v12  ;;  %2397 = vmatpush.msk.msra.mxu3 %vm398_vm0, %v227_v14  ;;  %v840_v14 = vld [vmem:[%s3976_s2 + $0xf8] sm:$0xff] }
  0x57   :  { %319 = vmatmul.f32.gmra.mxu0 %v232_v10  ;;  %v544_v10 = vld [vmem:[%s3975_s8 + $0x28] sm:$0xff] }
  0x59   :  { %365 = vmatmul.f32.gmra.mxu2 %v234_v13 }
  0x5b   :  { %388 = vmatmul.f32.gmra.mxu3 %v235_v15 }
  0x5c   :  { %342 = vmatmul.f32.gmra.mxu1 %v233_v16 }
  0xac   :  { %v149_v17 = vpop.f32.mrf.mxu0  ;;  %v172_v18 = vpop.f32.mrf.mxu1 }
  0xad   :  { %v173_v19 = vadd.f32 %v172_v18, %v149_v17 }
  0xb0   :  { %v195_v20 = vpop.f32.mrf.mxu2  ;;  %v218_v21 = vpop.f32.mrf.mxu3 }
  0xb1   :  { %v196_v22 = vadd.f32 %v195_v20, %v173_v19  ;;  %v587_v19 = vld [vmem:[%s3975_s8 + $0x38] sm:$0xff] }
  0xb3   :  { %v219_v23 = vadd.f32 %v218_v21, %v196_v22  ;;  %v501_v21 = vld [vmem:[%s3975_s8 + $0x18] sm:$0xff]  ;;  %v629_v22 = vld [vmem:[%s3975_s8 + $0x50] sm:$0xff] }
  0xb4   :  { %v152_v24 = vpop.f32.mrf.mxu0  ;;  %v175_v25 = vpop.f32.mrf.mxu1 }
  0xb5   :  { %225 = vst.msk [vmem:[%s3973_s20] sm:$0xff] %vm224_vm1, %v219_v23  ;;  %2308 = vmatmul.msk.f32.vlgmr.msra.gmra.mxu0 %vm224_vm1, %v219_v23  ;;  %v176_v26 = vadd.f32 %v175_v25, %v152_v24  ;;  %v715_v23 = vld [vmem:[%s3975_s8 + $0x70] sm:$0xff]  ;;  %v758_v24 = vld [vmem:[%s3975_s8 + $0x80] sm:$0xff]  ;;  %v630_v25 = vld [vmem:[%s3975_s8 + $0x58] sm:$0xff] }
  0xb8   :  { %v198_v27 = vpop.f32.mrf.mxu2  ;;  %v221_v28 = vpop.f32.mrf.mxu3 }
  0xb9   :  { %v199_v29 = vadd.f32 %v198_v27, %v176_v26  ;;  %v672_v26 = vld [vmem:[%s3975_s8 + $0x60] sm:$0xff]  ;;  %v716_v27 = vld [vmem:[%s3975_s8 + $0x78] sm:$0xff] }
  0xbb   :  { %v222_v30 = vadd.f32 %v221_v28, %v199_v29  ;;  %v759_v28 = vld [vmem:[%s3975_s8 + $0x88] sm:$0xff] }
  0xbc   :  { %v673_v29 = vld [vmem:[%s3975_s8 + $0x68] sm:$0xff] }
  0xbd   :  { %226 = vst.msk [vmem:[%s3973_s20 + $0x8] sm:$0xff] %vm224_vm1, %v222_v30  ;;  %2309 = vmatmul.msk.f32.vlgmr.msra.gmra.mxu3 %vm224_vm1, %v222_v30  ;;  %s2628_s20 = smov 122   ;;  %v823_v30 = vld [vmem:[%s3976_s2 + $0x70] sm:$0xff] }
  0xcc   :  { %v317_v31 = vpop.f32.mrf.mxu0 }
  0xd1   :  { %v340_v32 = vpop.f32.mrf.mxu1 }
  0xd2   :  { %v341_v37 = vadd.f32 %v340_v32, %v317_v31  ;;  %v839_v31 = vld [vmem:[%s3976_s2 + $0xf0] sm:$0xff]  ;;  %v822_v32 = vld [vmem:[%s3976_s2 + $0x68] sm:$0xff] }
  0xd4   :  { %v363_v34 = vpop.f32.mrf.mxu2  ;;  %v320_v35 = vpop.f32.mrf.mxu0 }
  0xd5   :  { %v364_v41 = vadd.f32 %v363_v34, %v341_v37  ;;  %v821_v34 = vld [vmem:[%s3976_s2 + $0x60] sm:$0xff]  ;;  %v836_v37 = vld [vmem:[%s3976_s2 + $0xd8] sm:$0xff] }
  0xd6   :  { %v386_v33 = vpop.f32.mrf.mxu3 }
  0xd7   :  { %v387_v43 = vadd.f32 %v386_v33, %v364_v41  ;;  %v838_v33 = vld [vmem:[%s3976_s2 + $0xe8] sm:$0xff] }
  0xd8   :  { %v834_v41 = vld [vmem:[%s3976_s2 + $0xc8] sm:$0xff] }
  0xd9   :  { %v343_v36 = vpop.f32.mrf.mxu1 }
  0xda   :  { %v344_v39 = vadd.f32 %v343_v36, %v320_v35  ;;  %v837_v35 = vld [vmem:[%s3976_s2 + $0xe0] sm:$0xff]  ;;  %v820_v36 = vld [vmem:[%s3976_s2 + $0x58] sm:$0xff] }
  0xdc   :  { %v366_v40 = vpop.f32.mrf.mxu2 }
  0xdd   :  { %v367_v42 = vadd.f32 %v366_v40, %v344_v39  ;;  %v835_v39 = vld [vmem:[%s3976_s2 + $0xd0] sm:$0xff]  ;;  %v818_v40 = vld [vmem:[%s3976_s2 + $0x48] sm:$0xff] }
  0xde   :  { %v389_v38 = vpop.f32.mrf.mxu3 }
  0xdf   :  { %v390_v45 = vadd.f32 %v389_v38, %v367_v42  ;;  %v819_v38 = vld [vmem:[%s3976_s2 + $0x50] sm:$0xff]  ;;  %v817_v42 = vld [vmem:[%s3976_s2 + $0x40] sm:$0xff] }
 0x132   :  { %v419_v44 = vpop.f32.mrf.mxu0 }
 0x133   :  { %v420_v47 = vadd.f32 %v419_v44, %v387_v43  ;;  %v833_v43 = vld [vmem:[%s3976_s2 + $0xc0] sm:$0xff]  ;;  %v816_v44 = vld [vmem:[%s3976_s2 + $0x38] sm:$0xff] }
 0x140   :  { %v422_v46 = vpop.f32.mrf.mxu3 }
 0x141   :  { %v423_v48 = vadd.f32 %v422_v46, %v390_v45  ;;  %v832_v45 = vld [vmem:[%s3976_s2 + $0xb8] sm:$0xff]  ;;  %v815_v46 = vld [vmem:[%s3976_s2 + $0x30] sm:$0xff] }
 0x143   :  { %450 = vmatpush.msra.mxu1 %v423_v48  ;;  %v2432_v49 = vpack.i.bf16 %v420_v47, %v423_v48 }
 0x145   :  { %2433 = vrot.lane.b32.xlu2 %v2432_v49, %s2628_s20  ;;  %2423 = vrot.lane.b32.xlu1 %v2432_v49, %s2629_s26 }
 0x146   :  { %2413 = vrot.lane.b32.xlu0 %v2432_v49, %s2630_s27  ;;  %451 = vmatpush.msra.mxu1 %v420_v47  ;;  %v831_v47 = vld [vmem:[%s3976_s2 + $0xb0] sm:$0xff] }
 0x147   :  { %2310 = vmatmul.msk.f32.vlgmr.msra.gmra.mxu1 %vm429_vm2, %v427_v50  ;;  %v830_v50 = vld [vmem:[%s3976_s2 + $0xa8] sm:$0xff] }
 0x14d   :  { %2438 = vrot.lane.b32.xlu2 %v2432_v49, %s2631_s28  ;;  %2428 = vrot.lane.b32.xlu1 %v2432_v49, %s2632_s11  ;;  %s2638_s11 = smov 110  }
 0x14e   :  { %2418 = vrot.lane.b32.xlu0 %v2432_v49, %s2633_s29 }
 0x14f   :  { %2311 = vmatmul.msk.f32.gmra.mxu1 %vm429_vm2, %v428_v51  ;;  %v813_v51 = vld [vmem:[%s3976_s2 + $0x20] sm:$0xff] }
 0x155   :  { %2448 = vrot.lane.b32.xlu1 %v2432_v49, %s2634_s4 }
 0x156   :  { %2443 = vrot.lane.b32.xlu0 %v2432_v49, %s2635_s30  ;;  %v814_v49 = vld [vmem:[%s3976_s2 + $0x28] sm:$0xff] }
 0x19f   :  { %v2434_v53 = vpop.permute.xlu2 %2433 }
 0x1a0   :  { %v2435_v61 = vunpack.i.l.bf16 %v2434_v53  ;;  %v2436_v62 = vunpack.i.h.bf16 %v2434_v53  ;;  %v812_v53 = vld [vmem:[%s3976_s2 + $0x18] sm:$0xff] }
 0x1a7   :  { %v2439_v4 = vpop.permute.xlu2 %2438 }
 0x1a8   :  { %v2440_v11 = vunpack.i.l.bf16 %v2439_v4  ;;  %v2441_v12 = vunpack.i.h.bf16 %v2439_v4  ;;  %v807_v4 = vld [vmem:[%s3977_s6 + $0x10] sm:$0xff] }
 0x1b7   :  { %v2424_v52 = vpop.permute.xlu1 %2423 }
 0x1b8   :  { %v2425_v54 = vunpack.i.l.bf16 %v2424_v52  ;;  %v2414_v55 = vpop.permute.xlu0 %2413  ;;  %v2426_v57 = vunpack.i.h.bf16 %v2424_v52  ;;  %v829_v52 = vld [vmem:[%s3976_s2 + $0xa0] sm:$0xff] }
 0x1b9   :  { %v2415_v56 = vunpack.i.l.bf16 %v2414_v55  ;;  %v2416_v59 = vunpack.i.h.bf16 %v2414_v55  ;;  %v811_v55 = vld [vmem:[%s3976_s2 + $0x10] sm:$0xff] }
 0x1ba   :  { %571 = vmatpush.msrb.mxu0 %v2425_v54  ;;  %v828_v54 = vld [vmem:[%s3976_s2 + $0x98] sm:$0xff] }
 0x1bb   :  { %491 = vmatpush.msra.mxu2 %v2415_v56  ;;  %v827_v56 = vld [vmem:[%s3976_s2 + $0x90] sm:$0xff] }
 0x1bc   :  { %572 = vmatpush.msrb.mxu0 %v2426_v57  ;;  %v810_v57 = vld [vmem:[%s3976_s2 + $0x8] sm:$0xff] }
 0x1bd   :  { %492 = vmatpush.msra.mxu2 %v2416_v59  ;;  %2316 = vmatmul.msk.f32.vlgmr.msrb.gmra.mxu0 %vm429_vm2, %v543_v58  ;;  %v826_v58 = vld [vmem:[%s3976_s2 + $0x88] sm:$0xff] }
 0x1be   :  { %2312 = vmatmul.msk.f32.vlgmr.msra.gmra.mxu2 %vm429_vm2, %v425_v60  ;;  %v809_v60 = vld [vmem:[%s3976_s2] sm:$0xff] }
 0x1bf   :  { %657 = vmatpush.msrb.mxu2 %v2435_v61  ;;  %v2429_v63 = vpop.permute.xlu1 %2428  ;;  %v825_v61 = vld [vmem:[%s3976_s2 + $0x80] sm:$0xff] }
 0x1c0   :  { %v2430_v1 = vunpack.i.l.bf16 %v2429_v63  ;;  %v2419_v2 = vpop.permute.xlu0 %2418  ;;  %v2431_v5 = vunpack.i.h.bf16 %v2429_v63  ;;  %v806_v63 = vld [vmem:[%s3977_s6 + $0x8] sm:$0xff] }
 0x1c1   :  { %v2420_v3 = vunpack.i.l.bf16 %v2419_v2  ;;  %658 = vmatpush.msrb.mxu2 %v2436_v62  ;;  %v2421_v7 = vunpack.i.h.bf16 %v2419_v2  ;;  %v805_v62 = vld [vmem:[%s3977_s6] sm:$0xff] }
 0x1c2   :  { %614 = vmatpush.msrb.mxu1 %v2430_v1 }
 0x1c3   :  { %841 = vmatpush.msra.mxu2 %v824_v0  ;;  %528 = vmatpush.msrb.mxu3 %v2420_v3  ;;  %v804_v0 = vld [vmem:[%s3978_s12 + $0x8] sm:$0xff]  ;;  %v803_v3 = vld [vmem:[%s3978_s12] sm:$0xff]  ;;  %s2637_s12 = smov 112  }
 0x1c4   :  { %615 = vmatpush.msrb.mxu1 %v2431_v5  ;;  %v453_v48 = vpop.f32.mrf.mxu1  ;;  %v808_v5 = vld [vmem:[%s3977_s6 + $0x18] sm:$0xff] }
 0x1c5   :  { %529 = vmatpush.msrb.mxu3 %v2421_v7  ;;  %2318 = vmatmul.msk.f32.vlgmr.msrb.gmra.mxu1 %vm429_vm2, %v586_v6  ;;  %v2612_v7 = vld [vmem:[%s3974_s14] ss:$0 sm:$0xff] }
 0x1c6   :  { %2313 = vmatmul.msk.f32.gmra.mxu2 %vm429_vm2, %v426_v8  ;;  %2314 = vmatmul.msk.f32.vlgmr.msrb.gmra.mxu3 %vm429_vm2, %v500_v9  ;;  %v2613_v8 = vld [vmem:[%s3974_s14 + $0x1] ss:$0 sm:$0xff] }
 0x1c7   :  { %700 = vmatpush.msra.mxu3 %v2440_v11  ;;  %v2449_v13 = vpop.permute.xlu1 %2448  ;;  %2317 = vmatmul.msk.f32.gmra.mxu0 %vm429_vm2, %v544_v10 }
 0x1c8   :  { %v2450_v15 = vunpack.i.l.bf16 %v2449_v13  ;;  %v2444_v16 = vpop.permute.xlu0 %2443  ;;  %v2451_v18 = vunpack.i.h.bf16 %v2449_v13  ;;  %842 = vmatpush.msra.mxu2 %v823_v30  ;;  %v2617_v30 = vld [vmem:[%s3974_s14 + $0x6] ss:$0 sm:$0xff] }
 0x1c9   :  { %v2445_v17 = vunpack.i.l.bf16 %v2444_v16  ;;  %701 = vmatpush.msra.mxu3 %v2441_v12  ;;  %v2446_v20 = vunpack.i.h.bf16 %v2444_v16  ;;  %v461_v12 = vmul.f32 %v2612_v7, %v453_v48 }
 0x1ca   :  { %786 = vmatpush.msra.mxu1 %v2450_v15  ;;  %843 = vmatpush.msra.mxu2 %v822_v32 }
 0x1cb   :  { %864 = vmatpush.msrb.mxu3 %v840_v14  ;;  %743 = vmatpush.msra.mxu0 %v2445_v17  ;;  %v2614_v14 = vld [vmem:[%s3974_s14 + $0x2] ss:$0 sm:$0xff] }
 0x1cc   :  { %787 = vmatpush.msra.mxu1 %v2451_v18  ;;  %844 = vmatpush.msra.mxu2 %v821_v34  ;;  %v456_v59 = vpop.f32.mrf.mxu1 }
 0x1cd   :  { %744 = vmatpush.msra.mxu0 %v2446_v20  ;;  %2319 = vmatmul.msk.f32.gmra.mxu1 %vm429_vm2, %v587_v19  ;;  %v2615_v19 = vld [vmem:[%s3974_s14 + $0x3] ss:$0 sm:$0xff] }
 0x1ce   :  { %2315 = vmatmul.msk.f32.gmra.mxu3 %vm429_vm2, %v501_v21  ;;  %2320 = vmatmul.msk.f32.vlgmr.msrb.gmra.mxu2 %vm429_vm2, %v629_v22  ;;  %v2616_v22 = vld [vmem:[%s3974_s14 + $0x5] ss:$0 sm:$0xff] }
 0x1cf   :  { %2324 = vmatmul.msk.f32.vlgmr.msra.gmra.mxu0 %vm429_vm2, %v715_v23  ;;  %865 = vmatpush.msrb.mxu3 %v839_v31  ;;  %v462_v23 = vmul.f32 %v2612_v7, %v456_v59  ;;  %v2618_v31 = vld [vmem:[%s3974_s14 + $0x7] ss:$0 sm:$0xff] }
 0x1d0   :  { %845 = vmatpush.msra.mxu2 %v820_v36  ;;  %907 = vmatpush.msrb.mxu0 %v804_v0  ;;  %v2619_v36 = vld [vmem:[%s3974_s14 + $0x8] ss:$0 sm:$0xff]  ;;  %v918_v7 = vld [vmem:[%s3981_s9] sm:$0xff] }
 0x1d1   :  { %866 = vmatpush.msrb.mxu3 %v838_v33 }
 0x1d2   :  { %846 = vmatpush.msra.mxu2 %v819_v38  ;;  %908 = vmatpush.msrb.mxu0 %v803_v3 }
 0x1d3   :  { %867 = vmatpush.msrb.mxu3 %v837_v35 }
 0x1d4   :  { %847 = vmatpush.msra.mxu2 %v818_v40 }
 0x1d5   :  { %2326 = vmatmul.msk.f32.vlgmr.msra.gmra.mxu1 %vm429_vm2, %v758_v24  ;;  %868 = vmatpush.msrb.mxu3 %v836_v37 }
 0x1d6   :  { %2321 = vmatmul.msk.f32.gmra.mxu2 %vm429_vm2, %v630_v25  ;;  %2322 = vmatmul.msk.f32.vlgmr.msra.gmra.mxu3 %vm429_vm2, %v672_v26 }
 0x1d7   :  { %2325 = vmatmul.msk.f32.gmra.mxu0 %vm429_vm2, %v716_v27  ;;  %869 = vmatpush.msrb.mxu3 %v835_v39 }
 0x1d8   :  { %848 = vmatpush.msra.mxu2 %v817_v42 }
 0x1d9   :  { %870 = vmatpush.msrb.mxu3 %v834_v41 }
 0x1da   :  { %849 = vmatpush.msra.mxu2 %v816_v44 }
 0x1db   :  { %871 = vmatpush.msrb.mxu3 %v833_v43 }
 0x1dc   :  { %850 = vmatpush.msra.mxu2 %v815_v46 }
 0x1dd   :  { %2327 = vmatmul.msk.f32.gmra.mxu1 %vm429_vm2, %v759_v28  ;;  %872 = vmatpush.msrb.mxu3 %v832_v45 }
 0x1de   :  { %2323 = vmatmul.msk.f32.gmra.mxu3 %vm429_vm2, %v673_v29  ;;  %851 = vmatpush.msra.mxu2 %v814_v49 }
 0x1df   :  { %873 = vmatpush.msrb.mxu3 %v831_v47 }
 0x1e0   :  { %852 = vmatpush.msra.mxu2 %v813_v51 }
 0x1e1   :  { %874 = vmatpush.msrb.mxu3 %v830_v50 }
 0x1e2   :  { %853 = vmatpush.msra.mxu2 %v812_v53 }
 0x1e3   :  { %875 = vmatpush.msrb.mxu3 %v829_v52 }
 0x1e4   :  { %854 = vmatpush.msra.mxu2 %v811_v55 }
 0x1e5   :  { %876 = vmatpush.msrb.mxu3 %v828_v54 }
 0x1e6   :  { %855 = vmatpush.msra.mxu2 %v810_v57 }
 0x1e7   :  { %877 = vmatpush.msrb.mxu3 %v827_v56 }
 0x1e8   :  { %856 = vmatpush.msra.mxu2 %v809_v60 }
 0x1e9   :  { %878 = vmatpush.msrb.mxu3 %v826_v58  ;;  %857 = vmatmul.f32.vlgmr.msra.gmra.mxu2 %v805_v62 }
 0x1eb   :  { %879 = vmatpush.msrb.mxu3 %v825_v61 }
 0x1ec   :  { %880 = vmatmul.f32.vlgmr.msrb.gmra.mxu3 %v806_v63 }
 0x1f1   :  { %860 = vmatmul.f32.gmra.mxu2 %v807_v4 }
 0x1f4   :  { %883 = vmatmul.f32.gmra.mxu3 %v808_v5 }
 0x23a   :  { %v574_v2 = vpop.f32.mrf.mxu0 }
 0x23b   :  { %v582_v18 = vmul.f32 %v2614_v14, %v574_v2 }
 0x241   :  { %v494_v1 = vpop.f32.mrf.mxu2 }
 0x242   :  { %v617_v6 = vpop.f32.mrf.mxu1  ;;  %v495_v16 = vadd.f32 %v494_v1, %v461_v12  ;;  %v1033_v12 = vld [vmem:[%s3981_s9 + $0x20] sm:$0xff] }
 0x243   :  { %v625_v25 = vmul.f32 %v2615_v19, %v617_v6 }
 0x244   :  { %v577_v11 = vpop.f32.mrf.mxu0 }
 0x245   :  { %v583_v35 = vmul.f32 %v2614_v14, %v577_v11 }
 0x249   :  { %v497_v9 = vpop.f32.mrf.mxu2  ;;  %v531_v10 = vpop.f32.mrf.mxu3 }
 0x24a   :  { %v539_v13 = vmul.f32 %v2613_v8, %v531_v10  ;;  %v620_v15 = vpop.f32.mrf.mxu1  ;;  %v498_v28 = vadd.f32 %v497_v9, %v462_v23 }
 0x24b   :  { %v626_v43 = vmul.f32 %v2615_v19, %v620_v15 }
 0x24c   :  { %v541_v17 = vadd.f32 %v539_v13, %v495_v16  ;;  %v746_v27 = vpop.f32.mrf.mxu0  ;;  %v990_v16 = vld [vmem:[%s3981_s9 + $0x10] sm:$0xff] }
 0x24d   :  { %v754_v40 = vmul.f32 %v2618_v31, %v746_v27  ;;  %v1076_v27 = vld [vmem:[%s3981_s9 + $0x30] sm:$0xff] }
 0x24e   :  { %v584_v24 = vadd.f32 %v582_v18, %v541_v17  ;;  %v1034_v17 = vld [vmem:[%s3981_s9 + $0x28] sm:$0xff]  ;;  %v991_v18 = vld [vmem:[%s3981_s9 + $0x18] sm:$0xff] }
 0x250   :  { %v627_v33 = vadd.f32 %v625_v25, %v584_v24 }
 0x251   :  { %v534_v20 = vpop.f32.mrf.mxu3  ;;  %v660_v21 = vpop.f32.mrf.mxu2 }
 0x252   :  { %v540_v26 = vmul.f32 %v2613_v8, %v534_v20  ;;  %v668_v29 = vmul.f32 %v2616_v22, %v660_v21  ;;  %v789_v32 = vpop.f32.mrf.mxu1  ;;  %v919_v8 = vld [vmem:[%s3981_s9 + $0x8] sm:$0xff] }
 0x253   :  { %v797_v45 = vmul.f32 %v2619_v36, %v789_v32 }
 0x254   :  { %v542_v34 = vadd.f32 %v540_v26, %v498_v28  ;;  %v670_v38 = vadd.f32 %v668_v29, %v627_v33  ;;  %v749_v48 = vpop.f32.mrf.mxu0  ;;  %v916_v26 = vld [vmem:[%s3981_s9 + $0x40] sm:$0xff] }
 0x255   :  { %v755_v55 = vmul.f32 %v2618_v31, %v749_v48  ;;  %v1120_v48 = vld [vmem:[%s3981_s9 + $0x58] sm:$0xff] }
 0x256   :  { %v585_v42 = vadd.f32 %v583_v35, %v542_v34 }
 0x258   :  { %v628_v49 = vadd.f32 %v626_v43, %v585_v42 }
 0x259   :  { %v703_v37 = vpop.f32.mrf.mxu3  ;;  %v663_v41 = vpop.f32.mrf.mxu2 }
 0x25a   :  { %v711_v39 = vmul.f32 %v2617_v30, %v703_v37  ;;  %v669_v46 = vmul.f32 %v2616_v22, %v663_v41  ;;  %v792_v52 = vpop.f32.mrf.mxu1  ;;  %v1077_v37 = vld [vmem:[%s3981_s9 + $0x38] sm:$0xff] }
 0x25b   :  { %v798_v57 = vmul.f32 %v2619_v36, %v792_v52  ;;  %v917_v36 = vld [vmem:[%s3981_s9 + $0x48] sm:$0xff]  ;;  %v1356_v52 = vld [vmem:[%s3982_s3 + $0x120] sm:$0xff] }
 0x25c   :  { %v713_v44 = vadd.f32 %v711_v39, %v670_v38  ;;  %v671_v53 = vadd.f32 %v669_v46, %v628_v49  ;;  %v1205_v38 = vld [vmem:[%s3981_s9 + $0x70] sm:$0xff]  ;;  %v1365_v39 = vld [vmem:[%s3982_s3 + $0x168] sm:$0xff]  ;;  %v1162_v46 = vld [vmem:[%s3981_s9 + $0x60] sm:$0xff] }
 0x25d   :  { %v1249_v49 = vld [vmem:[%s3981_s9 + $0x88] sm:$0xff] }
 0x25e   :  { %v756_v47 = vadd.f32 %v754_v40, %v713_v44  ;;  %v1362_v40 = vld [vmem:[%s3982_s3 + $0x150] sm:$0xff] }
 0x25f   :  { %v1119_v44 = vld [vmem:[%s3981_s9 + $0x50] sm:$0xff] }
 0x260   :  { %v799_v50 = vadd.f32 %v797_v45, %v756_v47  ;;  %v1248_v45 = vld [vmem:[%s3981_s9 + $0x80] sm:$0xff]  ;;  %v1206_v47 = vld [vmem:[%s3981_s9 + $0x78] sm:$0xff] }
 0x261   :  { %v706_v51 = vpop.f32.mrf.mxu3 }
 0x262   :  { %801 = vst.msk [vmem:[%s3979_s19] sm:$0xff] %vm429_vm2, %v799_v50  ;;  %v712_v54 = vmul.f32 %v2617_v30, %v706_v51  ;;  %2328 = vmatmul.msk.f32.vlgmr.msrb.gmra.mxu0 %vm429_vm2, %v799_v50  ;;  %v1163_v50 = vld [vmem:[%s3981_s9 + $0x68] sm:$0xff]  ;;  %v1359_v51 = vld [vmem:[%s3982_s3 + $0x138] sm:$0xff] }
 0x264   :  { %v714_v56 = vadd.f32 %v712_v54, %v671_v53  ;;  %v1367_v53 = vld [vmem:[%s3982_s3 + $0x178] sm:$0xff]  ;;  %v1353_v54 = vld [vmem:[%s3982_s3 + $0x108] sm:$0xff] }
 0x266   :  { %v757_v58 = vadd.f32 %v755_v55, %v714_v56  ;;  %v1350_v55 = vld [vmem:[%s3982_s3 + $0xf0] sm:$0xff]  ;;  %v1347_v56 = vld [vmem:[%s3982_s3 + $0xd8] sm:$0xff] }
 0x268   :  { %v800_v59 = vadd.f32 %v798_v57, %v757_v58  ;;  %v1364_v57 = vld [vmem:[%s3982_s3 + $0x160] sm:$0xff] }
 0x269   :  { %v1344_v58 = vld [vmem:[%s3982_s3 + $0xc0] sm:$0xff] }
 0x26a   :  { %802 = vst.msk [vmem:[%s3979_s19 + $0x8] sm:$0xff] %vm429_vm2, %v800_v59  ;;  %2329 = vmatmul.msk.f32.gmra.mxu0 %vm429_vm2, %v800_v59  ;;  %s2636_s19 = smov 111   ;;  %v1361_v59 = vld [vmem:[%s3982_s3 + $0x148] sm:$0xff] }
 0x26c   :  { %v858_v60 = vpop.f32.mrf.mxu2 }
 0x26f   :  { %v881_v61 = vpop.f32.mrf.mxu3 }
 0x270   :  { %v882_v1 = vadd.f32 %v881_v61, %v858_v60  ;;  %v1341_v60 = vld [vmem:[%s3982_s3 + $0xa8] sm:$0xff]  ;;  %v1358_v61 = vld [vmem:[%s3982_s3 + $0x130] sm:$0xff] }
 0x274   :  { %v861_v63 = vpop.f32.mrf.mxu2 }
 0x277   :  { %v884_v0 = vpop.f32.mrf.mxu3 }
 0x278   :  { %v885_v2 = vadd.f32 %v884_v0, %v861_v63  ;;  %v1355_v63 = vld [vmem:[%s3982_s3 + $0x118] sm:$0xff] }
 0x279   :  { %v1335_v0 = vld [vmem:[%s3982_s3 + $0x78] sm:$0xff] }
 0x2df   :  { %v910_v62 = vpop.f32.mrf.mxu0 }
 0x2e0   :  { %v911_v4 = vadd.f32 %v910_v62, %v882_v1  ;;  %v1338_v62 = vld [vmem:[%s3982_s3 + $0x90] sm:$0xff]  ;;  %v1352_v1 = vld [vmem:[%s3982_s3 + $0x100] sm:$0xff] }
 0x2e7   :  { %v913_v3 = vpop.f32.mrf.mxu0 }
 0x2e8   :  { %v914_v5 = vadd.f32 %v913_v3, %v885_v2  ;;  %v1332_v2 = vld [vmem:[%s3982_s3 + $0x60] sm:$0xff]  ;;  %v1349_v3 = vld [vmem:[%s3982_s3 + $0xe8] sm:$0xff] }
 0x2ea   :  { %940 = vmatpush.msrb.mxu1 %v914_v5  ;;  %v2462_v6 = vpack.i.bf16 %v911_v4, %v914_v5  ;;  %v1346_v5 = vld [vmem:[%s3982_s3 + $0xd0] sm:$0xff] }
 0x2ec   :  { %2463 = vrot.lane.b32.xlu1 %v2462_v6, %s2631_s28  ;;  %2458 = vrot.lane.b32.xlu0 %v2462_v6, %s2635_s30 }
 0x2ed   :  { %2453 = vrot.lane.b32.xlu2 %v2462_v6, %s2629_s26  ;;  %941 = vmatpush.msrb.mxu1 %v911_v4  ;;  %v1329_v4 = vld [vmem:[%s3982_s3 + $0x48] sm:$0xff] }
 0x2ee   :  { %2330 = vmatmul.msk.f32.vlgmr.msrb.gmra.mxu1 %vm429_vm2, %v918_v7  ;;  %v1343_v7 = vld [vmem:[%s3982_s3 + $0xb8] sm:$0xff] }
 0x2f4   :  { %2478 = vrot.lane.b32.xlu1 %v2462_v6, %s2634_s4  ;;  %2473 = vrot.lane.b32.xlu0 %v2462_v6, %s2636_s19 }
 0x2f5   :  { %2468 = vrot.lane.b32.xlu2 %v2462_v6, %s2633_s29 }
 0x2f6   :  { %2331 = vmatmul.msk.f32.gmra.mxu1 %vm429_vm2, %v919_v8  ;;  %v1323_v8 = vld [vmem:[%s3982_s3 + $0x18] sm:$0xff] }
 0x2fc   :  { %2488 = vrot.lane.b32.xlu0 %v2462_v6, %s2637_s12 }
 0x2fd   :  { %2483 = vrot.lane.b32.xlu2 %v2462_v6, %s2638_s11  ;;  %v1326_v6 = vld [vmem:[%s3982_s3 + $0x30] sm:$0xff] }
 0x347   :  { %v2454_v9 = vpop.permute.xlu2 %2453 }
 0x348   :  { %v2455_v10 = vunpack.i.l.bf16 %v2454_v9  ;;  %v2456_v11 = vunpack.i.h.bf16 %v2454_v9  ;;  %v1340_v9 = vld [vmem:[%s3982_s3 + $0xa0] sm:$0xff] }
 0x34a   :  { %1061 = vmatpush.msrb.mxu2 %v2455_v10  ;;  %v1320_v10 = vld [vmem:[%s3982_s3] sm:$0xff] }
 0x34c   :  { %1062 = vmatpush.msrb.mxu2 %v2456_v11  ;;  %v1337_v11 = vld [vmem:[%s3982_s3 + $0x88] sm:$0xff] }
 0x34d   :  { %2336 = vmatmul.msk.f32.vlgmr.msrb.gmra.mxu2 %vm429_vm2, %v1033_v12 }
 0x34f   :  { %v2469_v13 = vpop.permute.xlu2 %2468 }
 0x350   :  { %v2470_v14 = vunpack.i.l.bf16 %v2469_v13  ;;  %v2471_v15 = vunpack.i.h.bf16 %v2469_v13  ;;  %v3579_v13 = vld [vmem:[%s3983_s7] sm:$0xff] }
 0x352   :  { %1018 = vmatpush.msra.mxu1 %v2470_v14  ;;  %v1334_v14 = vld [vmem:[%s3982_s3 + $0x70] sm:$0xff] }
 0x354   :  { %1019 = vmatpush.msra.mxu1 %v2471_v15  ;;  %v1315_v15 = vld [vmem:[%s3984_s13 + $0xa8] sm:$0xff] }
 0x355   :  { %2334 = vmatmul.msk.f32.vlgmr.msra.gmra.mxu1 %vm429_vm2, %v990_v16  ;;  %2337 = vmatmul.msk.f32.gmra.mxu2 %vm429_vm2, %v1034_v17  ;;  %v1317_v16 = vld [vmem:[%s3984_s13 + $0xb8] sm:$0xff] }
 0x356   :  { %v1331_v17 = vld [vmem:[%s3982_s3 + $0x58] sm:$0xff] }
 0x357   :  { %v2484_v23 = vpop.permute.xlu2 %2483 }
 0x358   :  { %v2485_v28 = vunpack.i.l.bf16 %v2484_v23  ;;  %v2486_v29 = vunpack.i.h.bf16 %v2484_v23  ;;  %v1366_v23 = vld [vmem:[%s3982_s3 + $0x170] sm:$0xff] }
 0x35d   :  { %2335 = vmatmul.msk.f32.gmra.mxu1 %vm429_vm2, %v991_v18  ;;  %v1312_v18 = vld [vmem:[%s3984_s13 + $0x90] sm:$0xff] }
 0x35e   :  { %v2464_v19 = vpop.permute.xlu1 %2463  ;;  %v2459_v20 = vpop.permute.xlu0 %2458 }
 0x35f   :  { %v2465_v21 = vunpack.i.l.bf16 %v2464_v19  ;;  %v2460_v22 = vunpack.i.l.bf16 %v2459_v20  ;;  %v2466_v24 = vunpack.i.h.bf16 %v2464_v19  ;;  %v2461_v25 = vunpack.i.h.bf16 %v2459_v20  ;;  %v1314_v19 = vld [vmem:[%s3984_s13 + $0xa0] sm:$0xff] }
 0x360   :  { %v1328_v20 = vld [vmem:[%s3982_s3 + $0x40] sm:$0xff] }
 0x361   :  { %981 = vmatpush.msra.mxu0 %v2460_v22  ;;  %1104 = vmatpush.msra.mxu3 %v2465_v21  ;;  %v1309_v21 = vld [vmem:[%s3984_s13 + $0x78] sm:$0xff]  ;;  %v1311_v22 = vld [vmem:[%s3984_s13 + $0x88] sm:$0xff] }
 0x363   :  { %982 = vmatpush.msra.mxu0 %v2461_v25  ;;  %1105 = vmatpush.msra.mxu3 %v2466_v24  ;;  %v1325_v24 = vld [vmem:[%s3982_s3 + $0x28] sm:$0xff]  ;;  %v1306_v25 = vld [vmem:[%s3984_s13 + $0x60] sm:$0xff] }
 0x364   :  { %2332 = vmatmul.msk.f32.vlgmr.msra.gmra.mxu0 %vm429_vm2, %v916_v26  ;;  %2338 = vmatmul.msk.f32.vlgmr.msra.gmra.mxu3 %vm429_vm2, %v1076_v27  ;;  %v1308_v26 = vld [vmem:[%s3984_s13 + $0x70] sm:$0xff]  ;;  %v3624_v27 = vld [vmem:[%s3983_s7 + $0x8] sm:$0xff] }
 0x365   :  { %1276 = vmatpush.msrb.mxu3 %v2485_v28  ;;  %v1363_v28 = vld [vmem:[%s3982_s3 + $0x158] sm:$0xff] }
 0x366   :  { %v2479_v30 = vpop.permute.xlu1 %2478  ;;  %v2474_v31 = vpop.permute.xlu0 %2473 }
 0x367   :  { %v2480_v32 = vunpack.i.l.bf16 %v2479_v30  ;;  %v2475_v33 = vunpack.i.l.bf16 %v2474_v31  ;;  %1277 = vmatpush.msrb.mxu3 %v2486_v29  ;;  %v2481_v34 = vunpack.i.h.bf16 %v2479_v30  ;;  %v2476_v35 = vunpack.i.h.bf16 %v2474_v31  ;;  %v1322_v29 = vld [vmem:[%s3982_s3 + $0x10] sm:$0xff]  ;;  %v1303_v31 = vld [vmem:[%s3984_s13 + $0x48] sm:$0xff] }
 0x369   :  { %1147 = vmatpush.msrb.mxu0 %v2480_v32  ;;  %1233 = vmatpush.msra.mxu2 %v2475_v33  ;;  %v1305_v32 = vld [vmem:[%s3984_s13 + $0x58] sm:$0xff]  ;;  %v1360_v33 = vld [vmem:[%s3982_s3 + $0x140] sm:$0xff] }
 0x36a   :  { %1451 = vmatpush.msra.mxu3 %v1315_v15  ;;  %v1324_v15 = vld [vmem:[%s3982_s3 + $0x20] sm:$0xff] }
 0x36b   :  { %1148 = vmatpush.msrb.mxu0 %v2481_v34  ;;  %1234 = vmatpush.msra.mxu2 %v2476_v35  ;;  %v3574_v12 = vpop.f32.mrf.mxu1  ;;  %v1300_v34 = vld [vmem:[%s3984_s13 + $0x30] sm:$0xff]  ;;  %v1302_v35 = vld [vmem:[%s3984_s13 + $0x40] sm:$0xff] }
 0x36c   :  { %2333 = vmatmul.msk.f32.gmra.mxu0 %vm429_vm2, %v917_v36  ;;  %2339 = vmatmul.msk.f32.gmra.mxu3 %vm429_vm2, %v1077_v37  ;;  %v1357_v36 = vld [vmem:[%s3982_s3 + $0x128] sm:$0xff]  ;;  %v1297_v37 = vld [vmem:[%s3984_s13 + $0x18] sm:$0xff] }
 0x36d   :  { %2344 = vmatmul.msk.f32.vlgmr.msra.gmra.mxu2 %vm429_vm2, %v1205_v38  ;;  %1368 = vmatpush.msra.mxu0 %v1365_v39  ;;  %v1299_v38 = vld [vmem:[%s3984_s13 + $0x28] sm:$0xff]  ;;  %v1354_v39 = vld [vmem:[%s3982_s3 + $0x110] sm:$0xff] }
 0x36e   :  { %v2489_v41 = vpop.permute.xlu0 %2488  ;;  %1414 = vmatpush.msrb.mxu2 %v1367_v53  ;;  %1452 = vmatpush.msra.mxu3 %v1312_v18  ;;  %v1307_v53 = vld [vmem:[%s3984_s13 + $0x68] sm:$0xff] }
 0x36f   :  { %v2490_v42 = vunpack.i.l.bf16 %v2489_v41  ;;  %1369 = vmatpush.msra.mxu0 %v1362_v40  ;;  %v2491_v43 = vunpack.i.h.bf16 %v2489_v41  ;;  %v1294_v40 = vld [vmem:[%s3984_s13] sm:$0xff]  ;;  %v1296_v41 = vld [vmem:[%s3984_s13 + $0x10] sm:$0xff] }
 0x370   :  { %1415 = vmatpush.msrb.mxu2 %v1364_v57  ;;  %1453 = vmatpush.msra.mxu3 %v1309_v21  ;;  %v1301_v57 = vld [vmem:[%s3984_s13 + $0x38] sm:$0xff] }
 0x371   :  { %1190 = vmatpush.msrb.mxu1 %v2490_v42  ;;  %1370 = vmatpush.msra.mxu0 %v1359_v51  ;;  %v1351_v42 = vld [vmem:[%s3982_s3 + $0xf8] sm:$0xff]  ;;  %v2620_v51 = vld [vmem:[%s3980_s15] ss:$0 sm:$0xff] }
 0x372   :  { %1416 = vmatpush.msrb.mxu2 %v1361_v59  ;;  %1454 = vmatpush.msra.mxu3 %v1306_v25  ;;  %v1336_v59 = vld [vmem:[%s3982_s3 + $0x80] sm:$0xff] }
 0x373   :  { %1191 = vmatpush.msrb.mxu1 %v2491_v43  ;;  %1371 = vmatpush.msra.mxu0 %v1356_v52  ;;  %v3632_v30 = vpop.f32.mrf.mxu1  ;;  %v1316_v43 = vld [vmem:[%s3984_s13 + $0xb0] sm:$0xff] }
 0x374   :  { %2340 = vmatmul.msk.f32.vlgmr.msrb.gmra.mxu0 %vm429_vm2, %v1119_v44  ;;  %2346 = vmatmul.msk.f32.vlgmr.msrb.gmra.mxu3 %vm429_vm2, %v1248_v45  ;;  %v1348_v45 = vld [vmem:[%s3982_s3 + $0xe0] sm:$0xff]  ;;  %v1342_v52 = vld [vmem:[%s3982_s3 + $0xb0] sm:$0xff] }
 0x375   :  { %2342 = vmatmul.msk.f32.vlgmr.msrb.gmra.mxu1 %vm429_vm2, %v1162_v46  ;;  %2345 = vmatmul.msk.f32.gmra.mxu2 %vm429_vm2, %v1206_v47  ;;  %v1313_v46 = vld [vmem:[%s3984_s13 + $0x98] sm:$0xff] }
 0x376   :  { %1372 = vmatpush.msra.mxu0 %v1353_v54  ;;  %1417 = vmatpush.msrb.mxu2 %v1358_v61  ;;  %v2621_v54 = vld [vmem:[%s3980_s15 + $0x1] ss:$0 sm:$0xff] }
 0x377   :  { %1391 = vmatpush.msra.mxu1 %v1366_v23  ;;  %1455 = vmatpush.msra.mxu3 %v1303_v31  ;;  %v1298_v61 = vld [vmem:[%s3984_s13 + $0x20] sm:$0xff]  ;;  %v1321_v23 = vld [vmem:[%s3982_s3 + $0x8] sm:$0xff] }
 0x378   :  { %1373 = vmatpush.msra.mxu0 %v1350_v55  ;;  %1418 = vmatpush.msrb.mxu2 %v1355_v63  ;;  %v1339_v55 = vld [vmem:[%s3982_s3 + $0x98] sm:$0xff] }
 0x379   :  { %1392 = vmatpush.msra.mxu1 %v1363_v28  ;;  %1456 = vmatpush.msra.mxu3 %v1300_v34  ;;  %v2627_v34 = vld [vmem:[%s3980_s15 + $0x8] ss:$0 sm:$0xff] }
 0x37a   :  { %1374 = vmatpush.msra.mxu0 %v1347_v56  ;;  %1419 = vmatpush.msrb.mxu2 %v1352_v1  ;;  %v1304_v56 = vld [vmem:[%s3984_s13 + $0x50] sm:$0xff] }
 0x37b   :  { %1393 = vmatpush.msra.mxu1 %v1360_v33  ;;  %1457 = vmatpush.msra.mxu3 %v1297_v37 }
 0x37c   :  { %2341 = vmatmul.msk.f32.gmra.mxu0 %vm429_vm2, %v1120_v48  ;;  %2347 = vmatmul.msk.f32.gmra.mxu3 %vm429_vm2, %v1249_v49  ;;  %v1345_v49 = vld [vmem:[%s3982_s3 + $0xc8] sm:$0xff] }
 0x37d   :  { %2343 = vmatmul.msk.f32.gmra.mxu1 %vm429_vm2, %v1163_v50  ;;  %1375 = vmatpush.msra.mxu0 %v1344_v58  ;;  %v1310_v50 = vld [vmem:[%s3984_s13 + $0x80] sm:$0xff]  ;;  %v951_v58 = vmul.f32 %v2620_v51, %v3574_v12 }
 0x37e   :  { %1420 = vmatpush.msrb.mxu2 %v1349_v3  ;;  %1394 = vmatpush.msra.mxu1 %v1357_v36 }
 0x37f   :  { %1376 = vmatpush.msra.mxu0 %v1341_v60  ;;  %1458 = vmatpush.msra.mxu3 %v1294_v40 }
 0x380   :  { %1421 = vmatpush.msrb.mxu2 %v1346_v5  ;;  %1395 = vmatpush.msra.mxu1 %v1354_v39  ;;  %v2623_v5 = vld [vmem:[%s3980_s15 + $0x3] ss:$0 sm:$0xff] }
 0x381   :  { %1377 = vmatpush.msra.mxu0 %v1338_v62  ;;  %1474 = vmatpush.msrb.mxu3 %v1316_v43 }
 0x382   :  { %1422 = vmatpush.msrb.mxu2 %v1343_v7  ;;  %1396 = vmatpush.msra.mxu1 %v1351_v42  ;;  %v1330_v7 = vld [vmem:[%s3982_s3 + $0x50] sm:$0xff] }
 0x383   :  { %1378 = vmatpush.msra.mxu0 %v1335_v0  ;;  %1475 = vmatpush.msrb.mxu3 %v1313_v46  ;;  %v2622_v0 = vld [vmem:[%s3980_s15 + $0x2] ss:$0 sm:$0xff] }
 0x384   :  { %1423 = vmatpush.msrb.mxu2 %v1340_v9  ;;  %1397 = vmatpush.msra.mxu1 %v1348_v45 }
 0x385   :  { %1379 = vmatpush.msra.mxu0 %v1332_v2  ;;  %1476 = vmatpush.msrb.mxu3 %v1310_v50  ;;  %v1333_v2 = vld [vmem:[%s3982_s3 + $0x68] sm:$0xff] }
 0x386   :  { %1424 = vmatpush.msrb.mxu2 %v1337_v11  ;;  %1398 = vmatpush.msra.mxu1 %v1345_v49  ;;  %v952_v11 = vmul.f32 %v2620_v51, %v3632_v30 }
 0x387   :  { %1380 = vmatpush.msra.mxu0 %v1329_v4  ;;  %1477 = vmatpush.msrb.mxu3 %v1307_v53  ;;  %v1295_v4 = vld [vmem:[%s3984_s13 + $0x8] sm:$0xff] }
 0x388   :  { %1425 = vmatpush.msrb.mxu2 %v1334_v14  ;;  %1399 = vmatpush.msra.mxu1 %v1342_v52  ;;  %v2624_v14 = vld [vmem:[%s3980_s15 + $0x5] ss:$0 sm:$0xff] }
 0x389   :  { %1381 = vmatpush.msra.mxu0 %v1326_v6  ;;  %1478 = vmatpush.msrb.mxu3 %v1304_v56 }
 0x38a   :  { %1426 = vmatpush.msrb.mxu2 %v1331_v17  ;;  %1400 = vmatpush.msra.mxu1 %v1339_v55  ;;  %v2625_v17 = vld [vmem:[%s3980_s15 + $0x6] ss:$0 sm:$0xff] }
 0x38b   :  { %1382 = vmatpush.msra.mxu0 %v1323_v8  ;;  %1479 = vmatpush.msrb.mxu3 %v1301_v57 }
 0x38c   :  { %1427 = vmatpush.msrb.mxu2 %v1328_v20  ;;  %1401 = vmatpush.msra.mxu1 %v1336_v59 }
 0x38d   :  { %1383 = vmatpush.msra.mxu0 %v1320_v10  ;;  %1480 = vmatpush.msrb.mxu3 %v1298_v61  ;;  %v1327_v10 = vld [vmem:[%s3982_s3 + $0x38] sm:$0xff] }
 0x38e   :  { %1384 = vmatmul.f32.vlgmr.msra.gmra.mxu0 %v3579_v13  ;;  %1428 = vmatpush.msrb.mxu2 %v1325_v24 }
 0x38f   :  { %1497 = vmatpush.msrb.mxu0 %v1317_v16  ;;  %1402 = vmatpush.msra.mxu1 %v1333_v2 }
 0x390   :  { %1429 = vmatpush.msrb.mxu2 %v1322_v29  ;;  %1481 = vmatpush.msrb.mxu3 %v1295_v4 }
 0x391   :  { %1498 = vmatpush.msrb.mxu0 %v1314_v19  ;;  %1430 = vmatmul.f32.vlgmr.msrb.gmra.mxu2 %v3579_v13 }
 0x392   :  { %1403 = vmatpush.msra.mxu1 %v1330_v7 }
 0x393   :  { %1499 = vmatpush.msrb.mxu0 %v1311_v22  ;;  %v2626_v22 = vld [vmem:[%s3980_s15 + $0x7] ss:$0 sm:$0xff] }
 0x394   :  { %1404 = vmatpush.msra.mxu1 %v1327_v10 }
 0x395   :  { %1500 = vmatpush.msrb.mxu0 %v1308_v26 }
 0x396   :  { %1387 = vmatmul.f32.gmra.mxu0 %v3624_v27  ;;  %1405 = vmatpush.msra.mxu1 %v1324_v15  ;;  %v1515_v15 = vld [vmem:[%s3986_s10 + $0x8] sm:$0xff] }
 0x397   :  { %1501 = vmatpush.msrb.mxu0 %v1305_v32 }
 0x398   :  { %1406 = vmatpush.msra.mxu1 %v1321_v23 }
 0x399   :  { %1502 = vmatpush.msrb.mxu0 %v1302_v35  ;;  %1433 = vmatmul.f32.gmra.mxu2 %v3624_v27 }
 0x39a   :  { %1407 = vmatmul.f32.vlgmr.msra.gmra.mxu1 %v3579_v13 }
 0x39b   :  { %1503 = vmatpush.msrb.mxu0 %v1299_v38 }
 0x39d   :  { %1504 = vmatpush.msrb.mxu0 %v1296_v41 }
 0x3a2   :  { %1410 = vmatmul.f32.gmra.mxu1 %v3624_v27 }
 0x3d0   :  { %v1064_v44 = vpop.f32.mrf.mxu2 }
 0x3d1   :  { %v1072_v9 = vmul.f32 %v2622_v0, %v1064_v44 }
 0x3d2   :  { %v1021_v47 = vpop.f32.mrf.mxu1 }
 0x3d3   :  { %v1029_v63 = vmul.f32 %v2621_v54, %v1021_v47 }
 0x3d8   :  { %v1067_v1 = vpop.f32.mrf.mxu2 }
 0x3d9   :  { %v1073_v31 = vmul.f32 %v2622_v0, %v1067_v1 }
 0x3da   :  { %v1024_v6 = vpop.f32.mrf.mxu1 }
 0x3db   :  { %v1030_v20 = vmul.f32 %v2621_v54, %v1024_v6 }
 0x3e1   :  { %v984_v48 = vpop.f32.mrf.mxu0 }
 0x3e2   :  { %v985_v62 = vadd.f32 %v984_v48, %v951_v58 }
 0x3e4   :  { %v1031_v8 = vadd.f32 %v1029_v63, %v985_v62 }
 0x3e6   :  { %v1074_v18 = vadd.f32 %v1072_v9, %v1031_v8 }
 0x3e7   :  { %v1107_v60 = vpop.f32.mrf.mxu3 }
 0x3e8   :  { %v1115_v12 = vmul.f32 %v2623_v5, %v1107_v60 }
 0x3e9   :  { %v987_v3 = vpop.f32.mrf.mxu0 }
 0x3ea   :  { %v988_v19 = vadd.f32 %v987_v3, %v952_v11  ;;  %v1117_v25 = vadd.f32 %v1115_v12, %v1074_v18 }
 0x3ec   :  { %v1032_v30 = vadd.f32 %v1030_v20, %v988_v19 }
 0x3ee   :  { %v1075_v38 = vadd.f32 %v1073_v31, %v1032_v30 }
 0x3ef   :  { %v1110_v16 = vpop.f32.mrf.mxu3 }
 0x3f0   :  { %v1236_v21 = vpop.f32.mrf.mxu2  ;;  %v1116_v35 = vmul.f32 %v2623_v5, %v1110_v16 }
 0x3f1   :  { %v1150_v24 = vpop.f32.mrf.mxu0  ;;  %v1244_v33 = vmul.f32 %v2626_v22, %v1236_v21 }
 0x3f2   :  { %v1158_v26 = vmul.f32 %v2624_v14, %v1150_v24  ;;  %v1193_v28 = vpop.f32.mrf.mxu1  ;;  %v1118_v43 = vadd.f32 %v1116_v35, %v1075_v38 }
 0x3f3   :  { %v1201_v29 = vmul.f32 %v2625_v17, %v1193_v28 }
 0x3f4   :  { %v1160_v32 = vadd.f32 %v1158_v26, %v1117_v25 }
 0x3f6   :  { %v1203_v36 = vadd.f32 %v1201_v29, %v1160_v32 }
 0x3f7   :  { %v1279_v37 = vpop.f32.mrf.mxu3 }
 0x3f8   :  { %v1246_v39 = vadd.f32 %v1244_v33, %v1203_v36  ;;  %v1287_v40 = vmul.f32 %v2627_v34, %v1279_v37  ;;  %v1239_v42 = vpop.f32.mrf.mxu2  ;;  %v1512_v33 = vld [vmem:[%s3986_s10 + $0x40] sm:$0xff] }
 0x3f9   :  { %v1153_v41 = vpop.f32.mrf.mxu0  ;;  %v1245_v48 = vmul.f32 %v2626_v22, %v1239_v42 }
 0x3fa   :  { %v1289_v44 = vadd.f32 %v1287_v40, %v1246_v39  ;;  %v1159_v45 = vmul.f32 %v2624_v14, %v1153_v41  ;;  %v1196_v46 = vpop.f32.mrf.mxu1  ;;  %v1514_v14 = vld [vmem:[%s3986_s10] sm:$0xff] }
 0x3fb   :  { %v1202_v47 = vmul.f32 %v2625_v17, %v1196_v46 }
 0x3fc   :  { %1292 = vst.msk [vmem:[%s3985_s18] sm:$0xff] %vm1291_vm3, %v1289_v44  ;;  %v1161_v13 = vadd.f32 %v1159_v45, %v1118_v43  ;;  %2348 = vmatmul.msk.f32.vlgmr.msra.gmra.mxu3 %vm1291_vm3, %v1289_v44  ;;  %2352 = vmatmul.msk.f32.vlgmr.msrb.gmra.mxu0 %vm1291_vm3, %v1289_v44 }
 0x3fe   :  { %v1204_v49 = vadd.f32 %v1202_v47, %v1161_v13  ;;  %v1513_v47 = vld [vmem:[%s3986_s10 + $0x48] sm:$0xff] }
 0x3ff   :  { %v1282_v50 = vpop.f32.mrf.mxu3 }
 0x400   :  { %v1247_v51 = vadd.f32 %v1245_v48, %v1204_v49  ;;  %v1288_v52 = vmul.f32 %v2627_v34, %v1282_v50 }
 0x402   :  { %v1290_v53 = vadd.f32 %v1288_v52, %v1247_v51 }
 0x404   :  { %1293 = vst.msk [vmem:[%s3985_s18 + $0x8] sm:$0xff] %vm1291_vm3, %v1290_v53  ;;  %2349 = vmatmul.msk.f32.gmra.mxu3 %vm1291_vm3, %v1290_v53  ;;  %2353 = vmatmul.msk.f32.gmra.mxu0 %vm1291_vm3, %v1290_v53  ;;  %s2639_s18 = smov 96  }
 0x40b   :  { %v1385_v54 = vpop.f32.mrf.mxu0 }
 0x40c   :  { %2350 = vmatmul.msk.f32.vlgmr.msrb.gmra.mxu3 %vm1291_vm3, %v1289_v44  ;;  %v1657_v44 = vld [vmem:[%s3986_s10 + $0x10] sm:$0xff] }
 0x413   :  { %v1388_v27 = vpop.f32.mrf.mxu0 }
 0x414   :  { %2351 = vmatmul.msk.f32.gmra.mxu3 %vm1291_vm3, %v1290_v53  ;;  %v1431_v59 = vpop.f32.mrf.mxu2 }
 0x417   :  { %v1408_v62 = vpop.f32.mrf.mxu1 }
 0x41c   :  { %v1434_v2 = vpop.f32.mrf.mxu2 }
 0x41f   :  { %v1411_v4 = vpop.f32.mrf.mxu1 }
 0x479   :  { %v1506_v60 = vpop.f32.mrf.mxu0 }
 0x47a   :  { %v1507_v7 = vadd.f32 %v1506_v60, %v1431_v59 }
 0x47f   :  { %v1460_v55 = vpop.f32.mrf.mxu3 }
 0x480   :  { %v1461_v57 = vadd.f32 %v1460_v55, %v1385_v54 }
 0x481   :  { %v1509_v3 = vpop.f32.mrf.mxu0 }
 0x482   :  { %v1510_v5 = vadd.f32 %v1509_v3, %v1434_v2 }
 0x484   :  { %v2507_v10 = vpack.i.bf16 %v1507_v7, %v1510_v5 }
 0x487   :  { %v1463_v56 = vpop.f32.mrf.mxu3 }
 0x488   :  { %v1464_v58 = vadd.f32 %v1463_v56, %v1388_v27 }
 0x48a   :  { %1536 = vmatpush.msrb.mxu1 %v1464_v58  ;;  %v2607_v61 = vpack.i.bf16 %v1461_v57, %v1464_v58 }
 0x48c   :  { %1537 = vmatpush.msrb.mxu1 %v1461_v57 }
 0x48d   :  { %2354 = vmatmul.msk.f32.vlgmr.msrb.gmra.mxu1 %vm429_vm2, %v1514_v14 }
 0x48f   :  { %v1483_v63 = vpop.f32.mrf.mxu3 }
 0x490   :  { %v1484_v0 = vadd.f32 %v1483_v63, %v1408_v62 }
 0x492   :  { %v2492_v1 = vpack.i.bf16 %v1484_v0, %v1461_v57  ;;  %v2502_v12 = vpack.i.bf16 %v1507_v7, %v1484_v0 }
 0x494   :  { %2493 = vrot.lane.b32.xlu2 %v2492_v1, %s2636_s19 }
 0x495   :  { %2355 = vmatmul.msk.f32.gmra.mxu1 %vm429_vm2, %v1515_v15 }
 0x497   :  { %v1486_v6 = vpop.f32.mrf.mxu3 }
 0x498   :  { %v1487_v8 = vadd.f32 %v1486_v6, %v1411_v4 }
 0x49a   :  { %1559 = vmatpush.msra.mxu2 %v1487_v8  ;;  %v2512_v9 = vpack.i.bf16 %v1510_v5, %v1487_v8  ;;  %v2497_v11 = vpack.i.bf16 %v1487_v8, %v1464_v58  ;;  %v1658_v58 = vld [vmem:[%s3986_s10 + $0x18] sm:$0xff]  ;;  %v1837_v8 = vld [vmem:[%s3986_s10 + $0x30] sm:$0xff] }
 0x49c   :  { %2513 = vrot.lane.b32.xlu0 %v2512_v9, %s2633_s29  ;;  %2508 = vrot.lane.b32.xlu2 %v2507_v10, %s2636_s19 }
 0x49d   :  { %1560 = vmatpush.msra.mxu2 %v1484_v0  ;;  %2498 = vrot.lane.b32.xlu1 %v2497_v11, %s2636_s19  ;;  %s2640_s19 = smov 95  }
 0x49e   :  { %2356 = vmatmul.msk.f32.vlgmr.msra.gmra.mxu2 %vm429_vm2, %v1514_v14 }
 0x4a4   :  { %2523 = vrot.lane.b32.xlu2 %v2492_v1, %s2629_s26  ;;  %2518 = vrot.lane.b32.xlu0 %v2607_v61, %s2633_s29 }
 0x4a5   :  { %2503 = vrot.lane.b32.xlu1 %v2502_v12, %s2633_s29  ;;  %s2641_s29 = smov 94  }
 0x4a6   :  { %2357 = vmatmul.msk.f32.gmra.mxu2 %vm429_vm2, %v1515_v15 }
 0x4ac   :  { %2538 = vrot.lane.b32.xlu2 %v2507_v10, %s2629_s26  ;;  %2543 = vrot.lane.b32.xlu0 %v2512_v9, %s2637_s12 }
 0x4ad   :  { %2528 = vrot.lane.b32.xlu1 %v2497_v11, %s2629_s26 }
 0x4b4   :  { %2553 = vrot.lane.b32.xlu2 %v2492_v1, %s2638_s11  ;;  %2548 = vrot.lane.b32.xlu0 %v2607_v61, %s2637_s12 }
 0x4b5   :  { %2533 = vrot.lane.b32.xlu1 %v2502_v12, %s2637_s12 }
 0x4bc   :  { %2568 = vrot.lane.b32.xlu2 %v2507_v10, %s2638_s11  ;;  %2573 = vrot.lane.b32.xlu0 %v2512_v9, %s2639_s18 }
 0x4bd   :  { %2558 = vrot.lane.b32.xlu1 %v2497_v11, %s2638_s11 }
 0x4c4   :  { %2583 = vrot.lane.b32.xlu2 %v2492_v1, %s2640_s19  ;;  %2578 = vrot.lane.b32.xlu0 %v2607_v61, %s2639_s18 }
 0x4c5   :  { %2563 = vrot.lane.b32.xlu1 %v2502_v12, %s2639_s18 }
 0x4cc   :  { %2603 = vrot.lane.b32.xlu2 %v2507_v10, %s2640_s19  ;;  %2593 = vrot.lane.b32.xlu0 %v2512_v9, %s2641_s29 }
 0x4cd   :  { %2588 = vrot.lane.b32.xlu1 %v2497_v11, %s2640_s19  ;;  %v1748_v11 = vld [vmem:[%s3986_s10 + $0x28] sm:$0xff] }
 0x4d4   :  { %2608 = vrot.lane.b32.xlu0 %v2607_v61, %s2641_s29  ;;  %v1747_v61 = vld [vmem:[%s3986_s10 + $0x20] sm:$0xff] }
 0x4d5   :  { %2598 = vrot.lane.b32.xlu1 %v2502_v12, %s2641_s29 }
 0x4ee   :  { %v2494_v16 = vpop.permute.xlu2 %2493 }
 0x4ef   :  { %v2496_v20 = vunpack.i.h.bf16 %v2494_v16  ;;  %v2495_v21 = vunpack.i.l.bf16 %v2494_v16 }
 0x4f1   :  { %v1597_v34 = vsel %vm1596_vm5, %v2495_v21, %v2496_v20 }
 0x4f6   :  { %v2509_v17 = vpop.permute.xlu2 %2508 }
 0x4f7   :  { %v2511_v25 = vunpack.i.h.bf16 %v2509_v17  ;;  %v2510_v26 = vunpack.i.l.bf16 %v2509_v17 }
 0x4f9   :  { %v1598_v35 = vsel %vm1596_vm5, %v2496_v20, %v2511_v25 }
 0x4fe   :  { %v3794_v18 = vpop.permute.xlu2 %2523 }
 0x4ff   :  { %v2526_v48 = vunpack.i.h.bf16 %v3794_v18  ;;  %v2525_v49 = vunpack.i.l.bf16 %v3794_v18 }
 0x501   :  { %v1762_v62 = vsel %vm1761_vm7, %v2525_v49, %v2526_v48 }
 0x506   :  { %v2539_v36 = vpop.permute.xlu2 %2538 }
 0x507   :  { %v2541_v54 = vunpack.i.h.bf16 %v2539_v36  ;;  %v2540_v27 = vunpack.i.l.bf16 %v2539_v36 }
 0x509   :  { %v1763_v63 = vsel %vm1761_vm7, %v2526_v48, %v2541_v54  ;;  %v2018_v54 = vld [vmem:[%s3986_s10 + $0x68] sm:$0xff] }
 0x50e   :  { %v2514_v19 = vpop.permute.xlu0 %2513  ;;  %v3817_v50 = vpop.permute.xlu2 %2553 }
 0x50f   :  { %v2516_v22 = vunpack.i.h.bf16 %v2514_v19  ;;  %v2515_v23 = vunpack.i.l.bf16 %v2514_v19  ;;  %v2499_v24 = vpop.permute.xlu1 %2498  ;;  %v2556_v14 = vunpack.i.h.bf16 %v3817_v50  ;;  %v2555_v15 = vunpack.i.l.bf16 %v3817_v50 }
 0x510   :  { %v2501_v28 = vunpack.i.h.bf16 %v2499_v24  ;;  %v2500_v29 = vunpack.i.l.bf16 %v2499_v24  ;;  %v1838_v24 = vld [vmem:[%s3986_s10 + $0x38] sm:$0xff] }
 0x511   :  { %v1675_v30 = vsel %vm1671_vm4, %v2515_v23, %v2516_v22 }
 0x512   :  { %v1599_v31 = vsel %vm1596_vm5, %v2500_v29, %v2501_v28  ;;  %v1600_v32 = vsel %vm1596_vm5, %v2501_v28, %v2510_v26  ;;  %1723 = vmatpush.msrb.mxu2 %v1675_v30  ;;  %v1927_v29 = vld [vmem:[%s3986_s10 + $0x50] sm:$0xff]  ;;  %v1942_v30 = vsel %vm1941_vm9, %v2555_v15, %v2556_v14 }
 0x513   :  { %1625 = vmatpush.msra.mxu3 %v1599_v31  ;;  %1648 = vmatpush.msra.mxu0 %v1600_v32 }
 0x515   :  { %1626 = vmatpush.msra.mxu3 %v1597_v34  ;;  %1649 = vmatpush.msra.mxu0 %v1598_v35 }
 0x516   :  { %2358 = vmatmul.msk.f32.vlgmr.msra.gmra.mxu3 %vm429_vm2, %v1512_v33  ;;  %2360 = vmatmul.msk.f32.vlgmr.msra.gmra.mxu0 %vm429_vm2, %v1512_v33  ;;  %v2519_v37 = vpop.permute.xlu0 %2518  ;;  %v2569_v6 = vpop.permute.xlu2 %2568 }
 0x517   :  { %v2521_v38 = vunpack.i.h.bf16 %v2519_v37  ;;  %v2520_v39 = vunpack.i.l.bf16 %v2519_v37  ;;  %v2504_v40 = vpop.permute.xlu1 %2503  ;;  %v2571_v19 = vunpack.i.h.bf16 %v2569_v6  ;;  %v2570_v20 = vunpack.i.l.bf16 %v2569_v6  ;;  %v2198_v6 = vld [vmem:[%s3986_s10 + $0x88] sm:$0xff] }
 0x518   :  { %v2506_v41 = vunpack.i.h.bf16 %v2504_v40  ;;  %v2505_v42 = vunpack.i.l.bf16 %v2504_v40 }
 0x519   :  { %v1674_v43 = vsel %vm1671_vm4, %v2520_v39, %v2515_v23  ;;  %v1943_v31 = vsel %vm1941_vm9, %v2556_v14, %v2571_v19  ;;  %v2017_v39 = vld [vmem:[%s3986_s10 + $0x60] sm:$0xff] }
 0x51a   :  { %1700 = vmatpush.msra.mxu1 %v1674_v43  ;;  %v1673_v45 = vsel %vm1671_vm4, %v2505_v42, %v2506_v41  ;;  %v1672_v46 = vsel %vm1671_vm4, %v2521_v38, %v2505_v42  ;;  %v1928_v42 = vld [vmem:[%s3986_s10 + $0x58] sm:$0xff] }
 0x51b   :  { %1724 = vmatpush.msrb.mxu2 %v1673_v45 }
 0x51c   :  { %2364 = vmatmul.msk.f32.vlgmr.msrb.gmra.mxu2 %vm429_vm2, %v1657_v44  ;;  %1701 = vmatpush.msra.mxu1 %v1672_v46 }
 0x51d   :  { %2362 = vmatmul.msk.f32.vlgmr.msra.gmra.mxu1 %vm429_vm2, %v1657_v44 }
 0x51e   :  { %2359 = vmatmul.msk.f32.gmra.mxu3 %vm429_vm2, %v1513_v47  ;;  %2361 = vmatmul.msk.f32.gmra.mxu0 %vm429_vm2, %v1513_v47  ;;  %v2544_v13 = vpop.permute.xlu0 %2543  ;;  %v2584_v28 = vpop.permute.xlu2 %2583 }
 0x51f   :  { %v2546_v51 = vunpack.i.h.bf16 %v2544_v13  ;;  %v2545_v52 = vunpack.i.l.bf16 %v2544_v13  ;;  %v2529_v53 = vpop.permute.xlu1 %2528  ;;  %v2586_v45 = vunpack.i.h.bf16 %v2584_v28  ;;  %v2585_v46 = vunpack.i.l.bf16 %v2584_v28  ;;  %v2366_v28 = vld [vmem:[%s3987_s16 + $0x1] ss:$8 sm:$0x3] }
 0x520   :  { %v2531_v55 = vunpack.i.h.bf16 %v2529_v53  ;;  %v2530_v56 = vunpack.i.l.bf16 %v2529_v53 }
 0x521   :  { %v1855_v57 = vsel %vm1851_vm6, %v2545_v52, %v2546_v51 }
 0x522   :  { %v1764_v59 = vsel %vm1761_vm7, %v2530_v56, %v2531_v55  ;;  %v1765_v60 = vsel %vm1761_vm7, %v2531_v55, %v2540_v27  ;;  %1903 = vmatpush.msra.mxu2 %v1855_v57  ;;  %v2107_v56 = vld [vmem:[%s3986_s10 + $0x70] sm:$0xff]  ;;  %v2122_v57 = vsel %vm2121_vm11, %v2585_v46, %v2586_v45  ;;  %v3929_v46 = vld [vmem:[%s3987_s16 + $0x5] ss:$8 sm:$0x3] }
 0x523   :  { %1790 = vmatpush.msrb.mxu3 %v1764_v59  ;;  %1813 = vmatpush.msrb.mxu0 %v1765_v60 }
 0x524   :  { %2365 = vmatmul.msk.f32.gmra.mxu2 %vm429_vm2, %v1658_v58 }
 0x525   :  { %1791 = vmatpush.msrb.mxu3 %v1762_v62  ;;  %1814 = vmatpush.msrb.mxu0 %v1763_v63 }
 0x526   :  { %2363 = vmatmul.msk.f32.gmra.mxu1 %vm429_vm2, %v1658_v58  ;;  %2367 = vmatmul.msk.f32.vlgmr.msrb.gmra.mxu3 %vm429_vm2, %v1747_v61  ;;  %v2549_v0 = vpop.permute.xlu0 %2548  ;;  %v2604_v43 = vpop.permute.xlu2 %2603 }
 0x527   :  { %2369 = vmatmul.msk.f32.vlgmr.msrb.gmra.mxu0 %vm429_vm2, %v1747_v61  ;;  %v2551_v1 = vunpack.i.h.bf16 %v2549_v0  ;;  %v2550_v2 = vunpack.i.l.bf16 %v2549_v0  ;;  %v2534_v3 = vpop.permute.xlu1 %2533  ;;  %v2606_v49 = vunpack.i.h.bf16 %v2604_v43  ;;  %v2605_v50 = vunpack.i.l.bf16 %v2604_v43 }
 0x528   :  { %v2536_v4 = vunpack.i.h.bf16 %v2534_v3  ;;  %v2535_v5 = vunpack.i.l.bf16 %v2534_v3 }
 0x529   :  { %v1854_v7 = vsel %vm1851_vm6, %v2550_v2, %v2545_v52  ;;  %v2123_v58 = vsel %vm2121_vm11, %v2586_v45, %v2606_v49  ;;  %v2197_v2 = vld [vmem:[%s3986_s10 + $0x80] sm:$0xff]  ;;  %v1736_v45 = vperm.slane %v2366_v28, 1 }
 0x52a   :  { %1880 = vmatpush.msrb.mxu1 %v1854_v7  ;;  %v1853_v9 = vsel %vm1851_vm6, %v2535_v5, %v2536_v4  ;;  %v1852_v10 = vsel %vm1851_vm6, %v2551_v1, %v2535_v5  ;;  %v2108_v5 = vld [vmem:[%s3986_s10 + $0x78] sm:$0xff]  ;;  %v1539_v7 = vpop.f32.mrf.mxu1 }
 0x52b   :  { %1904 = vmatpush.msra.mxu2 %v1853_v9 }
 0x52c   :  { %2374 = vmatmul.msk.f32.vlgmr.msra.gmra.mxu2 %vm429_vm2, %v1837_v8  ;;  %1881 = vmatpush.msrb.mxu1 %v1852_v10 }
 0x52e   :  { %2368 = vmatmul.msk.f32.gmra.mxu3 %vm429_vm2, %v1748_v11  ;;  %2372 = vmatmul.msk.f32.vlgmr.msrb.gmra.mxu1 %vm429_vm2, %v1837_v8  ;;  %v2574_v12 = vpop.permute.xlu0 %2573  ;;  %v1562_v8 = vpop.f32.mrf.mxu2 }
 0x52f   :  { %2370 = vmatmul.msk.f32.gmra.mxu0 %vm429_vm2, %v1748_v11  ;;  %v2576_v16 = vunpack.i.h.bf16 %v2574_v12  ;;  %v2575_v17 = vunpack.i.l.bf16 %v2574_v12  ;;  %v2559_v18 = vpop.permute.xlu1 %2558 }
 0x530   :  { %v2561_v21 = vunpack.i.h.bf16 %v2559_v18  ;;  %v2560_v22 = vunpack.i.l.bf16 %v2559_v18 }
 0x531   :  { %v2035_v23 = vsel %vm2031_vm8, %v2575_v17, %v2576_v16 }
 0x532   :  { %v1944_v25 = vsel %vm1941_vm9, %v2560_v22, %v2561_v21  ;;  %v1945_v26 = vsel %vm1941_vm9, %v2561_v21, %v2570_v20  ;;  %2083 = vmatpush.msrb.mxu2 %v2035_v23  ;;  %v1542_v9 = vpop.f32.mrf.mxu1 }
 0x533   :  { %1970 = vmatpush.msra.mxu3 %v1944_v25  ;;  %1993 = vmatpush.msra.mxu0 %v1945_v26  ;;  %v1568_v26 = vld [vmem:[%s3987_s16] ss:$8 sm:$0x3] }
 0x534   :  { %2375 = vmatmul.msk.f32.gmra.mxu2 %vm429_vm2, %v1838_v24 }
 0x535   :  { %1971 = vmatpush.msra.mxu3 %v1942_v30  ;;  %1994 = vmatpush.msra.mxu0 %v1943_v31  ;;  %v1570_v31 = vperm.slane %v1568_v26, 0 }
 0x536   :  { %2373 = vmatmul.msk.f32.gmra.mxu1 %vm429_vm2, %v1838_v24  ;;  %2377 = vmatmul.msk.f32.vlgmr.msra.gmra.mxu3 %vm429_vm2, %v1927_v29  ;;  %v2579_v32 = vpop.permute.xlu0 %2578  ;;  %v3898_v11 = vpop.f32.mrf.mxu2 }
 0x537   :  { %2379 = vmatmul.msk.f32.vlgmr.msra.gmra.mxu0 %vm429_vm2, %v1927_v29  ;;  %v2581_v33 = vunpack.i.h.bf16 %v2579_v32  ;;  %v2580_v34 = vunpack.i.l.bf16 %v2579_v32  ;;  %v2564_v35 = vpop.permute.xlu1 %2563  ;;  %v1735_v32 = vperm.slane %v2366_v28, 0 }
 0x538   :  { %v2566_v36 = vunpack.i.h.bf16 %v2564_v35  ;;  %v2565_v37 = vunpack.i.l.bf16 %v2564_v35 }
 0x539   :  { %v2034_v38 = vsel %vm2031_vm8, %v2580_v34, %v2575_v17 }
 0x53a   :  { %2060 = vmatpush.msra.mxu1 %v2034_v38  ;;  %v2033_v40 = vsel %vm2031_vm8, %v2565_v37, %v2566_v36  ;;  %v2032_v41 = vsel %vm2031_vm8, %v2581_v33, %v2565_v37  ;;  %v3915_v33 = vld [vmem:[%s3987_s16 + $0x2] ss:$8 sm:$0x3]  ;;  %v3923_v36 = vld [vmem:[%s3987_s16 + $0x3] ss:$8 sm:$0x3]  ;;  %v1574_v38 = vmul.f32 %v1570_v31, %v1539_v7 }
 0x53b   :  { %2084 = vmatpush.msrb.mxu2 %v2033_v40  ;;  %v1825_v35 = vperm.slane %v3915_v33, 0  ;;  %v1826_v49 = vperm.slane %v3915_v33, 1  ;;  %v2391_v7 = vld [vmem:[%s3987_s16 + $0x7] ss:$8 sm:$0x3] }
 0x53c   :  { %2384 = vmatmul.msk.f32.vlgmr.msrb.gmra.mxu2 %vm429_vm2, %v2017_v39  ;;  %2061 = vmatpush.msra.mxu1 %v2032_v41  ;;  %v1571_v41 = vperm.slane %v1568_v26, 1 }
 0x53e   :  { %2378 = vmatmul.msk.f32.gmra.mxu3 %vm429_vm2, %v1928_v42  ;;  %2382 = vmatmul.msk.f32.vlgmr.msra.gmra.mxu1 %vm429_vm2, %v2017_v39  ;;  %v2594_v44 = vpop.permute.xlu0 %2593  ;;  %v1577_v26 = vmul.f32 %v1571_v41, %v3898_v11 }
 0x53f   :  { %2380 = vmatmul.msk.f32.gmra.mxu0 %vm429_vm2, %v1928_v42  ;;  %v2596_v47 = vunpack.i.h.bf16 %v2594_v44  ;;  %v2595_v13 = vunpack.i.l.bf16 %v2594_v44  ;;  %v2589_v48 = vpop.permute.xlu1 %2588  ;;  %v1915_v44 = vperm.slane %v3923_v36, 0 }
 0x540   :  { %v2591_v51 = vunpack.i.h.bf16 %v2589_v48  ;;  %v2590_v52 = vunpack.i.l.bf16 %v2589_v48  ;;  %v2005_v48 = vperm.slane %v3929_v46, 0 }
 0x541   :  { %v2215_v53 = vsel %vm2211_vm10, %v2595_v13, %v2596_v47 }
 0x542   :  { %v2124_v27 = vsel %vm2121_vm11, %v2590_v52, %v2591_v51  ;;  %v2125_v55 = vsel %vm2121_vm11, %v2591_v51, %v2605_v50  ;;  %2263 = vmatpush.msra.mxu2 %v2215_v53  ;;  %v3938_v50 = vld [vmem:[%s3987_s16 + $0x6] ss:$8 sm:$0x3]  ;;  %v1575_v52 = vmul.f32 %v1571_v41, %v1562_v8  ;;  %v2396_v8 = vld [vmem:[%s3987_s16 + $0x10] ss:$8 sm:$0x3] }
 0x543   :  { %2150 = vmatpush.msrb.mxu3 %v2124_v27  ;;  %2173 = vmatpush.msrb.mxu0 %v2125_v55  ;;  %v1576_v27 = vmul.f32 %v1570_v31, %v1542_v9 }
 0x544   :  { %2385 = vmatmul.msk.f32.gmra.mxu2 %vm429_vm2, %v2018_v54 }
 0x545   :  { %2151 = vmatpush.msrb.mxu3 %v2122_v57  ;;  %2174 = vmatpush.msrb.mxu0 %v2123_v58  ;;  %v1916_v57 = vperm.slane %v3923_v36, 1 }
 0x546   :  { %2383 = vmatmul.msk.f32.gmra.mxu1 %vm429_vm2, %v2018_v54  ;;  %2387 = vmatmul.msk.f32.vlgmr.msrb.gmra.mxu3 %vm429_vm2, %v2107_v56  ;;  %v2609_v59 = vpop.permute.xlu0 %2608 }
 0x547   :  { %2389 = vmatmul.msk.f32.vlgmr.msrb.gmra.mxu0 %vm429_vm2, %v2107_v56  ;;  %v2611_v60 = vunpack.i.h.bf16 %v2609_v59  ;;  %v2610_v61 = vunpack.i.l.bf16 %v2609_v59  ;;  %v2599_v62 = vpop.permute.xlu1 %2598 }
 0x548   :  { %v2601_v63 = vunpack.i.h.bf16 %v2599_v62  ;;  %v2600_v0 = vunpack.i.l.bf16 %v2599_v62 }
 0x549   :  { %v2214_v1 = vsel %vm2211_vm10, %v2610_v61, %v2595_v13 }
 0x54a   :  { %2240 = vmatpush.msrb.mxu1 %v2214_v1  ;;  %v2213_v3 = vsel %vm2211_vm10, %v2600_v0, %v2601_v63  ;;  %v2212_v4 = vsel %vm2211_vm10, %v2611_v60, %v2600_v0  ;;  %v2095_v60 = vperm.slane %v3938_v50, 0 }
 0x54b   :  { %2264 = vmatpush.msra.mxu2 %v2213_v3  ;;  %v2006_v3 = vperm.slane %v3929_v46, 1 }
 0x54c   :  { %2394 = vmatmul.msk.f32.vlgmr.msra.gmra.mxu2 %vm429_vm2, %v2197_v2  ;;  %2241 = vmatpush.msrb.mxu1 %v2212_v4 }
 0x54e   :  { %2388 = vmatmul.msk.f32.gmra.mxu3 %vm429_vm2, %v2108_v5  ;;  %2392 = vmatmul.msk.f32.vlgmr.msrb.gmra.mxu1 %vm429_vm2, %v2197_v2 }
 0x54f   :  { %2390 = vmatmul.msk.f32.gmra.mxu0 %vm429_vm2, %v2108_v5 }
 0x554   :  { %2395 = vmatmul.msk.f32.gmra.mxu2 %vm429_vm2, %v2198_v6 }
 0x556   :  { %2393 = vmatmul.msk.f32.gmra.mxu1 %vm429_vm2, %v2198_v6 }
 0x593   :  { %v1651_v10 = vpop.f32.mrf.mxu0 }
 0x594   :  { %v1652_v61 = vadd.f32 %v1651_v10, %v1575_v52 }
 0x599   :  { %v1628_v12 = vpop.f32.mrf.mxu3 }
 0x59a   :  { %v1703_v14 = vpop.f32.mrf.mxu1  ;;  %v1629_v42 = vadd.f32 %v1628_v12, %v1574_v38  ;;  %v2096_v12 = vperm.slane %v3938_v50, 1 }
 0x59b   :  { %v3900_v15 = vpop.f32.mrf.mxu0  ;;  %v1739_v39 = vmul.f32 %v1735_v32, %v1703_v14  ;;  %v2185_v14 = vperm.slane %v2391_v7, 0 }
 0x59c   :  { %v1655_v38 = vadd.f32 %v3900_v15, %v1577_v26 }
 0x59d   :  { %v1743_v13 = vadd.f32 %v1739_v39, %v1629_v42  ;;  %v2276_v42 = vperm.slane %v2396_v8, 1 }
 0x59f   :  { %v1726_v16 = vpop.f32.mrf.mxu2 }
 0x5a0   :  { %v1740_v55 = vmul.f32 %v1736_v45, %v1726_v16 }
 0x5a1   :  { %v1631_v17 = vpop.f32.mrf.mxu3 }
 0x5a2   :  { %v1632_v62 = vadd.f32 %v1631_v17, %v1576_v27  ;;  %v1744_v4 = vadd.f32 %v1740_v55, %v1652_v61 }
 0x5a3   :  { %v1706_v18 = vpop.f32.mrf.mxu1 }
 0x5a4   :  { %v1816_v19 = vpop.f32.mrf.mxu0  ;;  %v1741_v56 = vmul.f32 %v1735_v32, %v1706_v18 }
 0x5a5   :  { %v1830_v63 = vmul.f32 %v1826_v49, %v1816_v19 }
 0x5a6   :  { %v1745_v5 = vadd.f32 %v1741_v56, %v1632_v62 }
 0x5a7   :  { %v3902_v20 = vpop.f32.mrf.mxu2  ;;  %v1834_v16 = vadd.f32 %v1830_v63, %v1744_v4 }
 0x5a8   :  { %v1742_v28 = vmul.f32 %v1736_v45, %v3902_v20 }
 0x5a9   :  { %v1793_v21 = vpop.f32.mrf.mxu3 }
 0x5aa   :  { %v1829_v43 = vmul.f32 %v1825_v35, %v1793_v21  ;;  %v1746_v11 = vadd.f32 %v1742_v28, %v1655_v38 }
 0x5ab   :  { %v1883_v22 = vpop.f32.mrf.mxu1 }
 0x5ac   :  { %v3904_v23 = vpop.f32.mrf.mxu0  ;;  %v1833_v53 = vadd.f32 %v1829_v43, %v1743_v13  ;;  %v1919_v54 = vmul.f32 %v1915_v44, %v1883_v22 }
 0x5ad   :  { %v1832_v39 = vmul.f32 %v1826_v49, %v3904_v23 }
 0x5ae   :  { %v1923_v2 = vadd.f32 %v1919_v54, %v1833_v53 }
 0x5af   :  { %v1906_v24 = vpop.f32.mrf.mxu2 }
 0x5b0   :  { %v1920_v6 = vmul.f32 %v1916_v57, %v1906_v24  ;;  %v2186_v24 = vperm.slane %v2391_v7, 1 }
 0x5b1   :  { %v1796_v25 = vpop.f32.mrf.mxu3 }
 0x5b2   :  { %v1831_v0 = vmul.f32 %v1825_v35, %v1796_v25  ;;  %v2275_v25 = vperm.slane %v2396_v8, 0  ;;  %v1924_v31 = vadd.f32 %v1920_v6, %v1834_v16 }
 0x5b3   :  { %v1886_v29 = vpop.f32.mrf.mxu1 }
 0x5b4   :  { %v1996_v30 = vpop.f32.mrf.mxu0  ;;  %v1835_v17 = vadd.f32 %v1831_v0, %v1745_v5  ;;  %v1921_v18 = vmul.f32 %v1915_v44, %v1886_v29 }
 0x5b5   :  { %v2010_v22 = vmul.f32 %v2006_v3, %v1996_v30 }
 0x5b6   :  { %v1925_v29 = vadd.f32 %v1921_v18, %v1835_v17 }
 0x5b7   :  { %v3917_v34 = vpop.f32.mrf.mxu2  ;;  %v2014_v30 = vadd.f32 %v2010_v22, %v1924_v31 }
 0x5b8   :  { %v1922_v20 = vmul.f32 %v1916_v57, %v3917_v34 }
 0x5b9   :  { %v1973_v37 = vpop.f32.mrf.mxu3 }
 0x5ba   :  { %v2009_v59 = vmul.f32 %v2005_v48, %v1973_v37 }
 0x5bb   :  { %v2063_v40 = vpop.f32.mrf.mxu1 }
 0x5bc   :  { %v3931_v47 = vpop.f32.mrf.mxu0  ;;  %v2013_v9 = vadd.f32 %v2009_v59, %v1923_v2  ;;  %v2099_v10 = vmul.f32 %v2095_v60, %v2063_v40 }
 0x5bd   :  { %v2012_v15 = vmul.f32 %v2006_v3, %v3931_v47 }
 0x5be   :  { %v2103_v33 = vadd.f32 %v2099_v10, %v2013_v9 }
 0x5bf   :  { %v2086_v51 = vpop.f32.mrf.mxu2 }
 0x5c0   :  { %v2100_v35 = vmul.f32 %v2096_v12, %v2086_v51 }
 0x5c1   :  { %v1976_v58 = vpop.f32.mrf.mxu3 }
 0x5c2   :  { %v2011_v36 = vmul.f32 %v2005_v48, %v1976_v58  ;;  %v2104_v41 = vadd.f32 %v2100_v35, %v2014_v30  ;;  %v1836_v48 = vadd.f32 %v1832_v39, %v1746_v11 }
 0x5c3   :  { %v2066_v1 = vpop.f32.mrf.mxu1 }
 0x5c4   :  { %v2176_v19 = vpop.f32.mrf.mxu0  ;;  %v2015_v45 = vadd.f32 %v2011_v36, %v1925_v29  ;;  %v2101_v13 = vmul.f32 %v2095_v60, %v2066_v1  ;;  %v1926_v49 = vadd.f32 %v1922_v20, %v1836_v48 }
 0x5c5   :  { %v2190_v43 = vmul.f32 %v2186_v24, %v2176_v19 }
 0x5c6   :  { %v2105_v27 = vadd.f32 %v2101_v13, %v2015_v45  ;;  %v2016_v58 = vadd.f32 %v2012_v15, %v1926_v49 }
 0x5c7   :  { %v2089_v21 = vpop.f32.mrf.mxu2  ;;  %v2194_v52 = vadd.f32 %v2190_v43, %v2104_v41 }
 0x5c8   :  { %v2102_v55 = vmul.f32 %v2096_v12, %v2089_v21 }
 0x5c9   :  { %v2153_v32 = vpop.f32.mrf.mxu3 }
 0x5ca   :  { %v2189_v37 = vmul.f32 %v2185_v14, %v2153_v32  ;;  %v2106_v61 = vadd.f32 %v2102_v55, %v2016_v58 }
 0x5cb   :  { %v2243_v40 = vpop.f32.mrf.mxu1 }
 0x5cc   :  { %v2193_v44 = vadd.f32 %v2189_v37, %v2103_v33  ;;  %v2279_v46 = vmul.f32 %v2275_v25, %v2243_v40  ;;  %v2179_v53 = vpop.f32.mrf.mxu0 }
 0x5cd   :  { %v2192_v59 = vmul.f32 %v2186_v24, %v2179_v53 }
 0x5ce   :  { %v2283_v50 = vadd.f32 %v2279_v46, %v2193_v44 }
 0x5cf   :  { %v2266_v51 = vpop.f32.mrf.mxu2  ;;  %v2196_v0 = vadd.f32 %v2192_v59, %v2106_v61 }
 0x5d0   :  { %2287 = vst [vmem:[%s3988_s17] sm:$0xff] %v2283_v50  ;;  %v2280_v23 = vmul.f32 %v2276_v42, %v2266_v51 }
 0x5d1   :  { %v2156_v54 = vpop.f32.mrf.mxu3 }
 0x5d2   :  { %v2284_v34 = vadd.f32 %v2280_v23, %v2194_v52  ;;  %v2191_v56 = vmul.f32 %v2185_v14, %v2156_v54 }
 0x5d3   :  { %v2246_v57 = vpop.f32.mrf.mxu1 }
 0x5d4   :  { %2288 = vst [vmem:[%s3988_s17 + $0x8] sm:$0xff] %v2284_v34  ;;  %v2195_v47 = vadd.f32 %v2191_v56, %v2105_v27  ;;  %v2281_v60 = vmul.f32 %v2275_v25, %v2246_v57 }
 0x5d6   :  { %v2285_v62 = vadd.f32 %v2281_v60, %v2195_v47 }
 0x5d7   :  { %v2269_v63 = vpop.f32.mrf.mxu2 }
 0x5d8   :  { %2289 = vst [vmem:[%s3988_s17 + $0x10] sm:$0xff] %v2285_v62  ;;  %v2282_v1 = vmul.f32 %v2276_v42, %v2269_v63 }
 0x5da   :  { %v2286_v2 = vadd.f32 %v2282_v1, %v2196_v0 }
 0x5dc   :  { %2290 = vst [vmem:[%s3988_s17 + $0x18] sm:$0xff] %v2286_v2 }

</bundles_post_ra>
